<compile_context>
chip_gen: v6e
topology: v6e:2x2x1
jax: 0.10.0
libtpu: 0.0.40
codegen_flags: <defaults>
</compile_context>

<pallas_src>
import functools

import numpy as np

import jax
import jax.numpy as jnp
from jax.experimental import pallas as pl
from jax.experimental.pallas import tpu as pltpu


# ----------------------------------------------------------------------------
# Generic linear (M-tiled, parallel grid)
# ----------------------------------------------------------------------------
def _linear_kernel(x_ref, w_ref, b_ref, o_ref, *, act):
    y = jnp.dot(x_ref[...], w_ref[...], preferred_element_type=jnp.float32)
    o_ref[...] = act(y + b_ref[...])


def linear(x2d, w_t, b_row, act=None):
    """y = act(x2d @ w_t + b_row). M is row-tiled when large enough."""
    act = act or (lambda v: v)
    M, K = x2d.shape
    N = w_t.shape[1]
    tm = M
    for cand in (512, 256, 128, 64, 32, 16, 8):
        if M > cand and M % cand == 0:
            tm = cand
            break
    return pl.pallas_call(
        functools.partial(_linear_kernel, act=act),
        grid=(M // tm,),
        in_specs=[
            pl.BlockSpec((tm, K), lambda i: (i, 0)),
            pl.BlockSpec((K, N), lambda i: (0, 0)),
            pl.BlockSpec((1, N), lambda i: (0, 0)),
        ],
        out_specs=pl.BlockSpec((tm, N), lambda i: (i, 0)),
        out_shape=jax.ShapeDtypeStruct((M, N), jnp.float32),
        compiler_params=pltpu.CompilerParams(dimension_semantics=("parallel",)),
    )(x2d, w_t, b_row)


# ----------------------------------------------------------------------------
# Bidirectional GRU: one kernel, grid=(2,) over directions
# ----------------------------------------------------------------------------
def _bigru_kernel(x_ref, wih_ref, bih_ref, whh_ref, bhh_ref, o_ref, xp_ref):
    """One GRU direction per grid step.

    x_ref  : (T, N, Ein)   sequence (recurrence over leading axis)
    wih_ref: (Ein, 3H)     input->hidden weights [r|z|n], bih_ref: (1, 3H)
    whh_ref: (H, 3H)       hidden->hidden fused weights,  bhh_ref: (1, 3H)
    o_ref  : (T, N, H)     hidden states
    xp_ref : (T, N, 3H)    VMEM scratch for the precomputed input projections
    """
    T, N, Ein = x_ref.shape
    H = o_ref.shape[-1]

    # One wide MXU matmul for the input projection of every timestep.
    xp = jnp.dot(x_ref[...].reshape(T * N, Ein), wih_ref[...],
                 preferred_element_type=jnp.float32) + bih_ref[...]
    xp_ref[...] = xp.reshape(T, N, 3 * H)

    # Hoist weight / bias loads out of the serial recurrence.
    whh = whh_ref[...]
    bhh = bhh_ref[...]

    def step(t, h):
        # One fused (N,H)x(H,3H) matmul per step instead of three.
        g = jnp.dot(h, whh, preferred_element_type=jnp.float32) + bhh
        xt = xp_ref[t]
        r = jax.nn.sigmoid(xt[:, :H] + g[:, :H])
        z = jax.nn.sigmoid(xt[:, H:2 * H] + g[:, H:2 * H])
        n = jnp.tanh(xt[:, 2 * H:] + r * g[:, 2 * H:])        # b_hn inside r* (torch semantics)
        h_new = (1.0 - z) * n + z * h
        o_ref[t] = h_new
        return h_new

    jax.lax.fori_loop(0, T, step, jnp.zeros((N, H), jnp.float32))


def bi_gru(x_seq, p):
    """Bidirectional GRU on seq-major (T, N, F), == torch.nn.GRU(batch_first=False)."""
    T, N, Ein = x_seq.shape
    H = p["w_hh_f"].shape[1]
    x_stack = jnp.stack([x_seq, x_seq[::-1]], axis=0)                              # (2,T,N,Ein)
    wih = jnp.stack([jnp.transpose(p["w_ih_f"]), jnp.transpose(p["w_ih_b"])], 0)   # (2,Ein,3H)
    bih = jnp.stack([p["b_ih_f"].reshape(1, -1), p["b_ih_b"].reshape(1, -1)], 0)   # (2,1,3H)
    whh = jnp.stack([jnp.transpose(p["w_hh_f"]), jnp.transpose(p["w_hh_b"])], 0)   # (2,H,3H)
    bhh = jnp.stack([p["b_hh_f"].reshape(1, -1), p["b_hh_b"].reshape(1, -1)], 0)   # (2,1,3H)

    out = pl.pallas_call(
        _bigru_kernel,
        grid=(2,),
        in_specs=[
            pl.BlockSpec((None, T, N, Ein), lambda d: (d, 0, 0, 0)),
            pl.BlockSpec((None, Ein, 3 * H), lambda d: (d, 0, 0)),
            pl.BlockSpec((None, 1, 3 * H), lambda d: (d, 0, 0)),
            pl.BlockSpec((None, H, 3 * H), lambda d: (d, 0, 0)),
            pl.BlockSpec((None, 1, 3 * H), lambda d: (d, 0, 0)),
        ],
        out_specs=pl.BlockSpec((None, T, N, H), lambda d: (d, 0, 0, 0)),
        out_shape=jax.ShapeDtypeStruct((2, T, N, H), jnp.float32),
        scratch_shapes=[pltpu.VMEM((T, N, 3 * H), jnp.float32)],
        compiler_params=pltpu.CompilerParams(dimension_semantics=("parallel",)),
    )(x_stack, wih, bih, whh, bhh)

    h_f = out[0]
    h_b = out[1][::-1]
    return jnp.concatenate([h_f, h_b], axis=-1)


# ----------------------------------------------------------------------------
# textcnn + concat + concat_fea Linear, fused into one kernel -> (B, J) context
# ----------------------------------------------------------------------------
def _textcnn_ctx_kernel(x_ref, wbig_ref, bconv_ref, wcf_ref, bcf_ref, o_ref,
                        *, kernel_sizes, channels):
    B, T, E = x_ref.shape
    C = channels
    xv = x_ref[...]
    # One wide projection matmul: (B*T, E) @ (E, sum_K K*C).
    y = jnp.dot(xv.reshape(B * T, E), wbig_ref[...], preferred_element_type=jnp.float32)
    y = y.reshape(B, T, y.shape[-1])
    bconv = bconv_ref[...]                                   # (1, len(K)*C)

    feats = []
    col = 0
    for kidx, K in enumerate(kernel_sizes):                  # statically unrolled
        L = T - K + 1
        acc = y[:, 0:L, col:col + C]
        col += C
        for j in range(1, K):
            acc = acc + y[:, j:j + L, col:col + C]
            col += C
        b_k = bconv[:, kidx * C:(kidx + 1) * C].reshape(1, 1, C)
        acc = jnp.maximum(acc + b_k, 0.0)                    # bias + ReLU
        feats.append(jnp.max(acc, axis=1))                   # global max-pool -> (B, C)

    feat = jnp.concatenate(feats, axis=1)                    # (B, 6C) == (B, 2H)
    o_ref[...] = (jnp.dot(feat, wcf_ref[...], preferred_element_type=jnp.float32)
                  + bcf_ref[...])


def textcnn_context(x, conv_params, cf_params):
    """x: (B, T, E) token embeddings -> (B, J) context (conv bank + concat_fea)."""
    B, T, E = x.shape
    C = conv_params[0]["w"].shape[0]
    kernel_sizes = tuple(int(cp["w"].shape[2]) for cp in conv_params)
    cols = []
    for cp in conv_params:
        w_t = jnp.transpose(cp["w"][:, 0], (1, 2, 0))        # (K, E, C)
        for j in range(w_t.shape[0]):
            cols.append(w_t[j])
    w_big = jnp.concatenate(cols, axis=1)                    # (E, sum_K K*C)
    b_conv = jnp.concatenate([cp["b"] for cp in conv_params]).reshape(1, -1)
    J = cf_params["w"].shape[0]
    kernel = functools.partial(_textcnn_ctx_kernel,
                               kernel_sizes=kernel_sizes, channels=C)
    return pl.pallas_call(
        kernel,
        out_shape=jax.ShapeDtypeStruct((B, J), jnp.float32),
    )(x, w_big, b_conv, jnp.transpose(cf_params["w"]), cf_params["b"].reshape(1, J))


# ----------------------------------------------------------------------------
# AttentionWithContext: whole (batched) problem in one block
# ----------------------------------------------------------------------------
def _attn_ctx_kernel(x_ref, ctx_ref, sel_ref, uw_ref, ub_ref, ucw_ref, ucb_ref,
                     ww_ref, o_ref):
    nB, R, J = x_ref.shape
    xv = x_ref[...]
    x2d = xv.reshape(nB * R, J)
    x1 = jnp.dot(x2d, uw_ref[...], preferred_element_type=jnp.float32) + ub_ref[...]
    x2s = jnp.dot(ctx_ref[...], ucw_ref[...], preferred_element_type=jnp.float32) + ucb_ref[...]
    # Reproduce the torch repeat/view pairing via a static one-hot selector matmul.
    x2 = jnp.dot(sel_ref[...], x2s, preferred_element_type=jnp.float32)
    u = jnp.tanh(x1 + x2)
    s = jnp.dot(u, ww_ref[...], preferred_element_type=jnp.float32).reshape(nB, R)
    m = jnp.max(s, axis=1, keepdims=True)
    e = jnp.exp(s - m)
    a = e * pl.reciprocal(jnp.sum(e, axis=1, keepdims=True), approx=True)
    o_ref[...] = jnp.sum(a[:, :, None] * xv, axis=1)         # (nB, J)


def attention_with_context_multi(x_list, ctx_list, p):
    """Run len(x_list) independent AttentionWithContext(x_i, ctx_i) calls (shared
    weights) in a single pallas_call. Each x_i: (B, R, J), each ctx_i: (B, J)."""
    n = len(x_list)
    B, R, J = x_list[0].shape
    x = jnp.concatenate(x_list, axis=0)                      # (n*B, R, J)
    ctx = jnp.concatenate(ctx_list, axis=0)                  # (n*B, J)
    nB = n * B

    # Static pairing: within each call, flat row k pairs with context[k % B].
    k = np.arange(nB * R)
    call = k // (B * R)
    k_local = k % (B * R)
    idx = call * B + (k_local % B)
    sel_np = np.zeros((nB * R, nB), dtype=np.float32)
    sel_np[np.arange(nB * R), idx] = 1.0
    sel = jnp.asarray(sel_np)

    out = pl.pallas_call(
        _attn_ctx_kernel,
        out_shape=jax.ShapeDtypeStruct((nB, J), jnp.float32),
    )(x, ctx, sel,
      jnp.transpose(p["u_w"]), p["u_b"].reshape(1, J),
      jnp.transpose(p["uc_w"]), p["uc_b"].reshape(1, J),
      jnp.transpose(p["W_w"]))
    return [out[i * B:(i + 1) * B] for i in range(n)]


# ----------------------------------------------------------------------------
# Parameter init (deterministic, synthetic — mirrors module __init__ shapes)
# ----------------------------------------------------------------------------
def init_params(key, cfg):
    V, E, H = cfg["vocab_size"], cfg["embedding_size"], cfg["hidden_size"]
    F, J = cfg["img_fea_dim"], cfg["joint_embedding_dim"]
    keys = iter(jax.random.split(key, 256))

    def nrm(shape, scale=0.01):
        return scale * jax.random.normal(next(keys), shape, dtype=jnp.float32)

    def gru(ein):
        return {
            "w_ih_f": nrm((3 * H, ein), 0.1), "w_hh_f": nrm((3 * H, H), 0.1),
            "b_ih_f": nrm((3 * H,), 0.1),     "b_hh_f": nrm((3 * H,), 0.1),
            "w_ih_b": nrm((3 * H, ein), 0.1), "w_hh_b": nrm((3 * H, H), 0.1),
            "b_ih_b": nrm((3 * H,), 0.1),     "b_hh_b": nrm((3 * H,), 0.1),
        }

    def attn_ctx():
        return {"u_w": nrm((J, J)), "u_b": jnp.zeros((J,), jnp.float32),
                "uc_w": nrm((J, J)), "uc_b": jnp.zeros((J,), jnp.float32),
                "W_w": nrm((1, J))}

    def attn_layer_p():
        D = 2 * H
        return {"u_w": nrm((D, D)), "u_b": jnp.zeros((D,), jnp.float32),
                "uc_w": nrm((1, D))}

    C = (2 * H) // 6
    # TODO(synk): word2vec weights come from a gensim checkpoint in the original;
    # a deterministic synthetic embedding table is used instead.
    return {
        "word2vec": nrm((V, E), 0.1),
        "img_feature": {"w": nrm((J, F)), "b": jnp.zeros((J,), jnp.float32)},
        # titleGRU/titleAtt/ingGRU/ingAtt exist in the module but their forward
        # results are never consumed by the returned outputs (dead code there).
        "titleGRU": gru(E), "titleAtt": attn_layer_p(),
        "ingGRU": gru(E),   "ingAtt": attn_layer_p(),
        "instrGRU1": gru(E), "instrGRU2": gru(2 * H),
        "img_att": attn_ctx(), "instr_att": attn_ctx(),
        "concat_fea": {"w": nrm((J, 2 * H)), "b": jnp.zeros((J,), jnp.float32)},
        "instr_fea": {"w": nrm((J, 2 * H)), "b": jnp.zeros((J,), jnp.float32)},
        "textcnn": [{"w": nrm((C, 1, K, E), 0.1), "b": jnp.zeros((C,), jnp.float32)}
                    for K in (1, 2, 3, 4, 5, 6)],
    }


# ----------------------------------------------------------------------------
# SALT forward
# ----------------------------------------------------------------------------
def salt_forward(params, cfg, img, title, ingredient, instruction):
    alpha = cfg["alpha"]
    H, J = cfg["hidden_size"], cfg["joint_embedding_dim"]
    emb = params["word2vec"]
    E = emb.shape[1]
    B, R, F = img.shape

    jf = params["img_feature"]
    double_tanh = lambda v: jnp.tanh(jnp.tanh(v))   # joint_embedding tanh + extra tanh in SALT

    # joint embedding of per-region features AND of the image mean, one launch.
    img_mean = jnp.mean(img, axis=1)                                         # (B, F)
    je_rows = jnp.concatenate([img.reshape(B * R, F), img_mean], axis=0)
    je = linear(je_rows, jnp.transpose(jf["w"]), jf["b"].reshape(1, -1), act=double_tanh)
    img_feature = je[:B * R].reshape(B, R, J)
    img_feature_mean = je[B * R:]                                            # (B, J)

    title_emb = jnp.take(emb, title, axis=0)                                 # (B, Tt, E)
    ing_emb = jnp.take(emb, ingredient, axis=0)                              # (B, Ti, E)

    # NOTE: the original also computes titleVec/ingredientVec (sent2vec) here; those
    # results never reach the returned outputs, so that dead work is skipped.

    # Fused textcnn conv bank + concat + concat_fea Linear -> (B, J) context.
    context_tok = jnp.concatenate([title_emb, ing_emb], axis=1)              # (B, Tt+Ti, E)
    context = textcnn_context(context_tok, params["textcnn"], params["concat_fea"])

    # Instruction branch (GRU quirk: recurrence runs over the FIRST fed axis).
    instr_emb = jnp.take(emb, instruction, axis=0)                           # (B, Ns, L, E)
    Ns, L = instruction.shape[1], instruction.shape[2]
    instr_emb = instr_emb.reshape(B * Ns, L, E)
    instr_enc = bi_gru(instr_emb, params["instrGRU1"])                       # (B*Ns, L, 2H)
    instr_sent = jnp.mean(instr_enc, axis=1).reshape(B, Ns, 2 * H)           # (B, Ns, 2H)
    instr_enc2 = bi_gru(instr_sent, params["instrGRU2"])                     # (B, Ns, 2H)
    inf = params["instr_fea"]
    instr_enc2 = linear(instr_enc2.reshape(B * Ns, 2 * H),
                        jnp.transpose(inf["w"]),
                        inf["b"].reshape(1, -1)).reshape(B, Ns, J)           # (B, Ns, J)

    # Batched attention: the two instr_att calls share weights, then the two img_att.
    instru_new_raw, instru_co_raw = attention_with_context_multi(
        [instr_enc2, instr_enc2], [context, img_feature_mean], params["instr_att"])
    img_new_raw, img_coatt_raw = attention_with_context_multi(
        [img_feature, img_feature], [context, instru_co_raw], params["img_att"])

    instru_new_fea = jnp.tanh(instru_new_raw) * alpha
    img_new_fea = jnp.tanh(img_new_raw) * alpha
    instru_co_fea = jnp.tanh(instru_co_raw) * (1.0 - alpha)
    img_coatt_fea = jnp.tanh(img_coatt_raw) * (1.0 - alpha)

    instru_co_super_fea = jnp.concatenate([instru_new_fea, instru_co_fea], axis=1)
    img_co_super_fea = jnp.concatenate([img_new_fea, img_coatt_fea], axis=1)
    return img_co_super_fea, instru_co_super_fea


# ----------------------------------------------------------------------------
# Demo
# ----------------------------------------------------------------------------
if __name__ == "__main__":
    cfg = dict(alpha=0.7, img_fea_dim=24, joint_embedding_dim=16, vocab_size=50,
               embedding_size=8, hidden_size=12,        # 2H = 24 divisible by 6 (textcnn)
               max_sentence_length=8, max_sentence_num=3)
    B, R, Tt, Ti = 2, 4, 8, 8

    key = jax.random.PRNGKey(0)
    k_p, k_img, k_t, k_i, k_s = jax.random.split(key, 5)
    params = init_params(k_p, cfg)

    img = jax.random.normal(k_img, (B, R, cfg["img_fea_dim"]), dtype=jnp.float32)
    title = jax.random.randint(k_t, (B, Tt), 0, cfg["vocab_size"])
    ingredient = jax.random.randint(k_i, (B, Ti), 0, cfg["vocab_size"])
    instruction = jax.random.randint(
        k_s, (B, cfg["max_sentence_num"], cfg["max_sentence_length"]), 0, cfg["vocab_size"])

    fwd = jax.jit(lambda im, ti, ig, ins: salt_forward(params, cfg, im, ti, ig, ins))
    img_fea, instru_fea = fwd(img, title, ingredient, instruction)
    jax.block_until_ready((img_fea, instru_fea))

    assert img_fea.shape == (B, 2 * cfg["joint_embedding_dim"])
    assert instru_fea.shape == (B, 2 * cfg["joint_embedding_dim"])
    assert img_fea.dtype == jnp.float32 and instru_fea.dtype == jnp.float32
    assert bool(jnp.all(jnp.isfinite(img_fea))) and bool(jnp.all(jnp.isfinite(instru_fea)))
    print("KERNEL_OK")
</pallas_src>

<mosaic_0001>
module attributes {stable_mosaic.version = 11 : i64} {
  func.func @_bigru_kernel(%arg0: i32, %arg1: memref<1x6x8x8xf32, #tpu.memory_space<vmem>>, %arg2: memref<1x8x36xf32, #tpu.memory_space<vmem>>, %arg3: memref<1x1x36xf32, #tpu.memory_space<vmem>>, %arg4: memref<1x12x36xf32, #tpu.memory_space<vmem>>, %arg5: memref<1x1x36xf32, #tpu.memory_space<vmem>>, %arg6: memref<1x6x8x12xf32, #tpu.memory_space<vmem>>, %arg7: memref<6x8x36xf32, #tpu.memory_space<vmem>>) attributes {dimension_semantics = [#tpu.dimension_semantics<parallel>], iteration_bounds = array<i64: 2>, scalar_prefetch = 0 : i64, scratch_operands = 1 : i64, tpu.core_type = #tpu.core_type<tc>, window_params = [{transform_indices = @transform_0, window_bounds = array<i64: 1, 6, 8, 8>}, {transform_indices = @transform_1, window_bounds = array<i64: 1, 8, 36>}, {transform_indices = @transform_2, window_bounds = array<i64: 1, 1, 36>}, {transform_indices = @transform_3, window_bounds = array<i64: 1, 12, 36>}, {transform_indices = @transform_4, window_bounds = array<i64: 1, 1, 36>}, {transform_indices = @transform_5, window_bounds = array<i64: 1, 6, 8, 12>}]} {
    %c0 = arith.constant 0 : index
    %c0_0 = arith.constant 0 : index
    %c0_1 = arith.constant 0 : index
    %c0_2 = arith.constant 0 : index
    %0 = vector.load %arg1[%c0, %c0_0, %c0_1, %c0_2] : memref<1x6x8x8xf32, #tpu.memory_space<vmem>>, vector<1x6x8x8xf32>
    %1 = vector.shape_cast %0 : vector<1x6x8x8xf32> to vector<6x8x8xf32>
    %2 = vector.shape_cast %1 : vector<6x8x8xf32> to vector<48x8xf32>
    %c0_3 = arith.constant 0 : index
    %c0_4 = arith.constant 0 : index
    %c0_5 = arith.constant 0 : index
    %3 = vector.load %arg2[%c0_3, %c0_4, %c0_5] : memref<1x8x36xf32, #tpu.memory_space<vmem>>, vector<1x8x36xf32>
    %4 = vector.shape_cast %3 : vector<1x8x36xf32> to vector<8x36xf32>
    %cst = arith.constant dense<0.000000e+00> : vector<48x36xf32>
    %5 = tpu.matmul %2, %4, %cst {dimension_numbers = #tpu.dot_dimension_numbers<[1], [0], [0], [1], [0, 0, 1, 1], [], []>} : vector<48x8xf32>, vector<8x36xf32>, vector<48x36xf32> -> vector<48x36xf32>
    %c0_6 = arith.constant 0 : index
    %c0_7 = arith.constant 0 : index
    %c0_8 = arith.constant 0 : index
    %6 = vector.load %arg3[%c0_6, %c0_7, %c0_8] : memref<1x1x36xf32, #tpu.memory_space<vmem>>, vector<1x1x36xf32>
    %7 = vector.shape_cast %6 : vector<1x1x36xf32> to vector<1x36xf32>
    %8 = vector.broadcast %7 : vector<1x36xf32> to vector<48x36xf32>
    %9 = arith.addf %5, %8 : vector<48x36xf32>
    %10 = vector.shape_cast %9 : vector<48x36xf32> to vector<6x8x36xf32>
    %c0_9 = arith.constant 0 : index
    %c0_10 = arith.constant 0 : index
    %c0_11 = arith.constant 0 : index
    %11 = vector.load %arg7[%c0_9, %c0_10, %c0_11] : memref<6x8x36xf32, #tpu.memory_space<vmem>>, vector<6x8x36xf32>
    tpu.vector_store %arg7[%c0_9, %c0_10, %c0_11], %10 {strides = array<i32>} : memref<6x8x36xf32, #tpu.memory_space<vmem>>, vector<6x8x36xf32>,
    %c0_12 = arith.constant 0 : index
    %c0_13 = arith.constant 0 : index
    %c0_14 = arith.constant 0 : index
    %12 = vector.load %arg4[%c0_12, %c0_13, %c0_14] : memref<1x12x36xf32, #tpu.memory_space<vmem>>, vector<1x12x36xf32>
    %13 = vector.shape_cast %12 : vector<1x12x36xf32> to vector<12x36xf32>
    %c0_15 = arith.constant 0 : index
    %c0_16 = arith.constant 0 : index
    %c0_17 = arith.constant 0 : index
    %14 = vector.load %arg5[%c0_15, %c0_16, %c0_17] : memref<1x1x36xf32, #tpu.memory_space<vmem>>, vector<1x1x36xf32>
    %15 = vector.shape_cast %14 : vector<1x1x36xf32> to vector<1x36xf32>
    %cst_18 = arith.constant 0.000000e+00 : f32
    %16 = vector.broadcast %cst_18 : f32 to vector<8x12xf32>
    %c0_i32 = arith.constant 0 : i32
    %c6_i32 = arith.constant 6 : i32
    %17 = arith.addi %c0_i32, %c6_i32 : i32
    %c1_i32 = arith.constant 1 : i32
    %18 = scf.for %arg8 = %c0_i32 to %17 step %c1_i32 iter_args(%arg9 = %16) -> (vector<8x12xf32>)  : i32 {
      %cst_20 = arith.constant dense<0.000000e+00> : vector<8x36xf32>
      %19 = tpu.matmul %arg9, %13, %cst_20 {dimension_numbers = #tpu.dot_dimension_numbers<[1], [0], [0], [1], [0, 0, 1, 1], [], []>} : vector<8x12xf32>, vector<12x36xf32>, vector<8x36xf32> -> vector<8x36xf32>
      %20 = vector.broadcast %15 : vector<1x36xf32> to vector<8x36xf32>
      %21 = arith.addf %19, %20 : vector<8x36xf32>
      %22 = arith.index_cast %arg8 : i32 to index
      %c0_21 = arith.constant 0 : index
      %c0_22 = arith.constant 0 : index
      %23 = vector.load %arg7[%22, %c0_21, %c0_22] : memref<6x8x36xf32, #tpu.memory_space<vmem>>, vector<1x8x36xf32>
      %24 = vector.shape_cast %23 : vector<1x8x36xf32> to vector<8x36xf32>
      %25 = vector.extract_strided_slice %24 {offsets = [0, 0], sizes = [8, 12], strides = [1, 1]} : vector<8x36xf32> to vector<8x12xf32>
      %26 = vector.extract_strided_slice %21 {offsets = [0, 0], sizes = [8, 12], strides = [1, 1]} : vector<8x36xf32> to vector<8x12xf32>
      %27 = arith.addf %25, %26 : vector<8x12xf32>
      %28 = arith.negf %27 : vector<8x12xf32>
      %29 = math.exp %28 : vector<8x12xf32>
      %cst_23 = arith.constant 1.000000e+00 : f32
      %30 = vector.broadcast %cst_23 : f32 to vector<8x12xf32>
      %31 = arith.addf %30, %29 : vector<8x12xf32>
      %32 = arith.divf %30, %31 : vector<8x12xf32>
      %33 = vector.extract_strided_slice %24 {offsets = [0, 12], sizes = [8, 12], strides = [1, 1]} : vector<8x36xf32> to vector<8x12xf32>
      %34 = vector.extract_strided_slice %21 {offsets = [0, 12], sizes = [8, 12], strides = [1, 1]} : vector<8x36xf32> to vector<8x12xf32>
      %35 = arith.addf %33, %34 : vector<8x12xf32>
      %36 = arith.negf %35 : vector<8x12xf32>
      %37 = math.exp %36 : vector<8x12xf32>
      %cst_24 = arith.constant 1.000000e+00 : f32
      %38 = vector.broadcast %cst_24 : f32 to vector<8x12xf32>
      %39 = arith.addf %38, %37 : vector<8x12xf32>
      %40 = arith.divf %38, %39 : vector<8x12xf32>
      %41 = vector.extract_strided_slice %24 {offsets = [0, 24], sizes = [8, 12], strides = [1, 1]} : vector<8x36xf32> to vector<8x12xf32>
      %42 = vector.extract_strided_slice %21 {offsets = [0, 24], sizes = [8, 12], strides = [1, 1]} : vector<8x36xf32> to vector<8x12xf32>
      %43 = arith.mulf %32, %42 : vector<8x12xf32>
      %44 = arith.addf %41, %43 : vector<8x12xf32>
      %45 = math.tanh %44 : vector<8x12xf32>
      %cst_25 = arith.constant 1.000000e+00 : f32
      %46 = vector.broadcast %cst_25 : f32 to vector<8x12xf32>
      %47 = arith.subf %46, %40 : vector<8x12xf32>
      %48 = arith.mulf %47, %45 : vector<8x12xf32>
      %49 = arith.mulf %40, %arg9 : vector<8x12xf32>
      %50 = arith.addf %48, %49 : vector<8x12xf32>
      %c0_26 = arith.constant 0 : index
      %51 = arith.index_cast %arg8 : i32 to index
      %c0_27 = arith.constant 0 : index
      %c0_28 = arith.constant 0 : index
      %52 = vector.load %arg6[%c0_26, %51, %c0_27, %c0_28] : memref<1x6x8x12xf32, #tpu.memory_space<vmem>>, vector<1x1x8x12xf32>
      %53 = vector.shape_cast %52 : vector<1x1x8x12xf32> to vector<8x12xf32>
      %54 = vector.shape_cast %50 : vector<8x12xf32> to vector<1x1x8x12xf32>
      tpu.vector_store %arg6[%c0_26, %51, %c0_27, %c0_28], %54 {strides = array<i32>} : memref<1x6x8x12xf32, #tpu.memory_space<vmem>>, vector<1x1x8x12xf32>,
      scf.yield %50 : vector<8x12xf32>
    }
    %c6_i32_19 = arith.constant 6 : i32
    return
  }
  func.func @transform_0(%arg0: i32) -> (i32, i32, i32, i32) {
    %c0_i32 = arith.constant 0 : i32
    %c0_i32_0 = arith.constant 0 : i32
    %c0_i32_1 = arith.constant 0 : i32
    %c0_i32_2 = arith.constant 0 : i32
    return %arg0, %c0_i32, %c0_i32_0, %c0_i32_1 : i32, i32, i32, i32
  }
  func.func @transform_1(%arg0: i32) -> (i32, i32, i32) {
    %c0_i32 = arith.constant 0 : i32
    %c0_i32_0 = arith.constant 0 : i32
    %c0_i32_1 = arith.constant 0 : i32
    return %arg0, %c0_i32, %c0_i32_0 : i32, i32, i32
  }
  func.func @transform_2(%arg0: i32) -> (i32, i32, i32) {
    %c0_i32 = arith.constant 0 : i32
    %c0_i32_0 = arith.constant 0 : i32
    %c0_i32_1 = arith.constant 0 : i32
    return %arg0, %c0_i32, %c0_i32_0 : i32, i32, i32
  }
  func.func @transform_3(%arg0: i32) -> (i32, i32, i32) {
    %c0_i32 = arith.constant 0 : i32
    %c0_i32_0 = arith.constant 0 : i32
    %c0_i32_1 = arith.constant 0 : i32
    return %arg0, %c0_i32, %c0_i32_0 : i32, i32, i32
  }
  func.func @transform_4(%arg0: i32) -> (i32, i32, i32) {
    %c0_i32 = arith.constant 0 : i32
    %c0_i32_0 = arith.constant 0 : i32
    %c0_i32_1 = arith.constant 0 : i32
    return %arg0, %c0_i32, %c0_i32_0 : i32, i32, i32
  }
  func.func @transform_5(%arg0: i32) -> (i32, i32, i32, i32) {
    %c0_i32 = arith.constant 0 : i32
    %c0_i32_0 = arith.constant 0 : i32
    %c0_i32_1 = arith.constant 0 : i32
    %c0_i32_2 = arith.constant 0 : i32
    return %arg0, %c0_i32, %c0_i32_0, %c0_i32_1 : i32, i32, i32, i32
  }
}

module attributes {stable_mosaic.version = 11 : i64} {
  func.func @_bigru_kernel(%arg0: i32, %arg1: memref<1x2x3x24xf32, #tpu.memory_space<vmem>>, %arg2: memref<1x24x36xf32, #tpu.memory_space<vmem>>, %arg3: memref<1x1x36xf32, #tpu.memory_space<vmem>>, %arg4: memref<1x12x36xf32, #tpu.memory_space<vmem>>, %arg5: memref<1x1x36xf32, #tpu.memory_space<vmem>>, %arg6: memref<1x2x3x12xf32, #tpu.memory_space<vmem>>, %arg7: memref<2x3x36xf32, #tpu.memory_space<vmem>>) attributes {dimension_semantics = [#tpu.dimension_semantics<parallel>], iteration_bounds = array<i64: 2>, scalar_prefetch = 0 : i64, scratch_operands = 1 : i64, tpu.core_type = #tpu.core_type<tc>, window_params = [{transform_indices = @transform_0, window_bounds = array<i64: 1, 2, 3, 24>}, {transform_indices = @transform_1, window_bounds = array<i64: 1, 24, 36>}, {transform_indices = @transform_2, window_bounds = array<i64: 1, 1, 36>}, {transform_indices = @transform_3, window_bounds = array<i64: 1, 12, 36>}, {transform_indices = @transform_4, window_bounds = array<i64: 1, 1, 36>}, {transform_indices = @transform_5, window_bounds = array<i64: 1, 2, 3, 12>}]} {
    %c0 = arith.constant 0 : index
    %c0_0 = arith.constant 0 : index
    %c0_1 = arith.constant 0 : index
    %c0_2 = arith.constant 0 : index
    %0 = vector.load %arg1[%c0, %c0_0, %c0_1, %c0_2] : memref<1x2x3x24xf32, #tpu.memory_space<vmem>>, vector<1x2x3x24xf32>
    %1 = vector.shape_cast %0 : vector<1x2x3x24xf32> to vector<2x3x24xf32>
    %2 = vector.shape_cast %1 : vector<2x3x24xf32> to vector<6x24xf32>
    %c0_3 = arith.constant 0 : index
    %c0_4 = arith.constant 0 : index
    %c0_5 = arith.constant 0 : index
    %3 = vector.load %arg2[%c0_3, %c0_4, %c0_5] : memref<1x24x36xf32, #tpu.memory_space<vmem>>, vector<1x24x36xf32>
    %4 = vector.shape_cast %3 : vector<1x24x36xf32> to vector<24x36xf32>
    %cst = arith.constant dense<0.000000e+00> : vector<6x36xf32>
    %5 = tpu.matmul %2, %4, %cst {dimension_numbers = #tpu.dot_dimension_numbers<[1], [0], [0], [1], [0, 0, 1, 1], [], []>} : vector<6x24xf32>, vector<24x36xf32>, vector<6x36xf32> -> vector<6x36xf32>
    %c0_6 = arith.constant 0 : index
    %c0_7 = arith.constant 0 : index
    %c0_8 = arith.constant 0 : index
    %6 = vector.load %arg3[%c0_6, %c0_7, %c0_8] : memref<1x1x36xf32, #tpu.memory_space<vmem>>, vector<1x1x36xf32>
    %7 = vector.shape_cast %6 : vector<1x1x36xf32> to vector<1x36xf32>
    %8 = vector.broadcast %7 : vector<1x36xf32> to vector<6x36xf32>
    %9 = arith.addf %5, %8 : vector<6x36xf32>
    %10 = vector.shape_cast %9 : vector<6x36xf32> to vector<2x3x36xf32>
    %c0_9 = arith.constant 0 : index
    %c0_10 = arith.constant 0 : index
    %c0_11 = arith.constant 0 : index
    %11 = vector.load %arg7[%c0_9, %c0_10, %c0_11] : memref<2x3x36xf32, #tpu.memory_space<vmem>>, vector<2x3x36xf32>
    tpu.vector_store %arg7[%c0_9, %c0_10, %c0_11], %10 {strides = array<i32>} : memref<2x3x36xf32, #tpu.memory_space<vmem>>, vector<2x3x36xf32>,
    %c0_12 = arith.constant 0 : index
    %c0_13 = arith.constant 0 : index
    %c0_14 = arith.constant 0 : index
    %12 = vector.load %arg4[%c0_12, %c0_13, %c0_14] : memref<1x12x36xf32, #tpu.memory_space<vmem>>, vector<1x12x36xf32>
    %13 = vector.shape_cast %12 : vector<1x12x36xf32> to vector<12x36xf32>
    %c0_15 = arith.constant 0 : index
    %c0_16 = arith.constant 0 : index
    %c0_17 = arith.constant 0 : index
    %14 = vector.load %arg5[%c0_15, %c0_16, %c0_17] : memref<1x1x36xf32, #tpu.memory_space<vmem>>, vector<1x1x36xf32>
    %15 = vector.shape_cast %14 : vector<1x1x36xf32> to vector<1x36xf32>
    %cst_18 = arith.constant 0.000000e+00 : f32
    %16 = vector.broadcast %cst_18 : f32 to vector<3x12xf32>
    %c0_i32 = arith.constant 0 : i32
    %c2_i32 = arith.constant 2 : i32
    %17 = arith.addi %c0_i32, %c2_i32 : i32
    %c1_i32 = arith.constant 1 : i32
    %18 = scf.for %arg8 = %c0_i32 to %17 step %c1_i32 iter_args(%arg9 = %16) -> (vector<3x12xf32>)  : i32 {
      %cst_20 = arith.constant dense<0.000000e+00> : vector<3x36xf32>
      %19 = tpu.matmul %arg9, %13, %cst_20 {dimension_numbers = #tpu.dot_dimension_numbers<[1], [0], [0], [1], [0, 0, 1, 1], [], []>} : vector<3x12xf32>, vector<12x36xf32>, vector<3x36xf32> -> vector<3x36xf32>
      %20 = vector.broadcast %15 : vector<1x36xf32> to vector<3x36xf32>
      %21 = arith.addf %19, %20 : vector<3x36xf32>
      %22 = arith.index_cast %arg8 : i32 to index
      %c0_21 = arith.constant 0 : index
      %c0_22 = arith.constant 0 : index
      %23 = vector.load %arg7[%22, %c0_21, %c0_22] : memref<2x3x36xf32, #tpu.memory_space<vmem>>, vector<1x3x36xf32>
      %24 = vector.shape_cast %23 : vector<1x3x36xf32> to vector<3x36xf32>
      %25 = vector.extract_strided_slice %24 {offsets = [0, 0], sizes = [3, 12], strides = [1, 1]} : vector<3x36xf32> to vector<3x12xf32>
      %26 = vector.extract_strided_slice %21 {offsets = [0, 0], sizes = [3, 12], strides = [1, 1]} : vector<3x36xf32> to vector<3x12xf32>
      %27 = arith.addf %25, %26 : vector<3x12xf32>
      %28 = arith.negf %27 : vector<3x12xf32>
      %29 = math.exp %28 : vector<3x12xf32>
      %cst_23 = arith.constant 1.000000e+00 : f32
      %30 = vector.broadcast %cst_23 : f32 to vector<3x12xf32>
      %31 = arith.addf %30, %29 : vector<3x12xf32>
      %32 = arith.divf %30, %31 : vector<3x12xf32>
      %33 = vector.extract_strided_slice %24 {offsets = [0, 12], sizes = [3, 12], strides = [1, 1]} : vector<3x36xf32> to vector<3x12xf32>
      %34 = vector.extract_strided_slice %21 {offsets = [0, 12], sizes = [3, 12], strides = [1, 1]} : vector<3x36xf32> to vector<3x12xf32>
      %35 = arith.addf %33, %34 : vector<3x12xf32>
      %36 = arith.negf %35 : vector<3x12xf32>
      %37 = math.exp %36 : vector<3x12xf32>
      %cst_24 = arith.constant 1.000000e+00 : f32
      %38 = vector.broadcast %cst_24 : f32 to vector<3x12xf32>
      %39 = arith.addf %38, %37 : vector<3x12xf32>
      %40 = arith.divf %38, %39 : vector<3x12xf32>
      %41 = vector.extract_strided_slice %24 {offsets = [0, 24], sizes = [3, 12], strides = [1, 1]} : vector<3x36xf32> to vector<3x12xf32>
      %42 = vector.extract_strided_slice %21 {offsets = [0, 24], sizes = [3, 12], strides = [1, 1]} : vector<3x36xf32> to vector<3x12xf32>
      %43 = arith.mulf %32, %42 : vector<3x12xf32>
      %44 = arith.addf %41, %43 : vector<3x12xf32>
      %45 = math.tanh %44 : vector<3x12xf32>
      %cst_25 = arith.constant 1.000000e+00 : f32
      %46 = vector.broadcast %cst_25 : f32 to vector<3x12xf32>
      %47 = arith.subf %46, %40 : vector<3x12xf32>
      %48 = arith.mulf %47, %45 : vector<3x12xf32>
      %49 = arith.mulf %40, %arg9 : vector<3x12xf32>
      %50 = arith.addf %48, %49 : vector<3x12xf32>
      %c0_26 = arith.constant 0 : index
      %51 = arith.index_cast %arg8 : i32 to index
      %c0_27 = arith.constant 0 : index
      %c0_28 = arith.constant 0 : index
      %52 = vector.load %arg6[%c0_26, %51, %c0_27, %c0_28] : memref<1x2x3x12xf32, #tpu.memory_space<vmem>>, vector<1x1x3x12xf32>
      %53 = vector.shape_cast %52 : vector<1x1x3x12xf32> to vector<3x12xf32>
      %54 = vector.shape_cast %50 : vector<3x12xf32> to vector<1x1x3x12xf32>
      tpu.vector_store %arg6[%c0_26, %51, %c0_27, %c0_28], %54 {strides = array<i32>} : memref<1x2x3x12xf32, #tpu.memory_space<vmem>>, vector<1x1x3x12xf32>,
      scf.yield %50 : vector<3x12xf32>
    }
    %c2_i32_19 = arith.constant 2 : i32
    return
  }
  func.func @transform_0(%arg0: i32) -> (i32, i32, i32, i32) {
    %c0_i32 = arith.constant 0 : i32
    %c0_i32_0 = arith.constant 0 : i32
    %c0_i32_1 = arith.constant 0 : i32
    %c0_i32_2 = arith.constant 0 : i32
    return %arg0, %c0_i32, %c0_i32_0, %c0_i32_1 : i32, i32, i32, i32
  }
  func.func @transform_1(%arg0: i32) -> (i32, i32, i32) {
    %c0_i32 = arith.constant 0 : i32
    %c0_i32_0 = arith.constant 0 : i32
    %c0_i32_1 = arith.constant 0 : i32
    return %arg0, %c0_i32, %c0_i32_0 : i32, i32, i32
  }
  func.func @transform_2(%arg0: i32) -> (i32, i32, i32) {
    %c0_i32 = arith.constant 0 : i32
    %c0_i32_0 = arith.constant 0 : i32
    %c0_i32_1 = arith.constant 0 : i32
    return %arg0, %c0_i32, %c0_i32_0 : i32, i32, i32
  }
  func.func @transform_3(%arg0: i32) -> (i32, i32, i32) {
    %c0_i32 = arith.constant 0 : i32
    %c0_i32_0 = arith.constant 0 : i32
    %c0_i32_1 = arith.constant 0 : i32
    return %arg0, %c0_i32, %c0_i32_0 : i32, i32, i32
  }
  func.func @transform_4(%arg0: i32) -> (i32, i32, i32) {
    %c0_i32 = arith.constant 0 : i32
    %c0_i32_0 = arith.constant 0 : i32
    %c0_i32_1 = arith.constant 0 : i32
    return %arg0, %c0_i32, %c0_i32_0 : i32, i32, i32
  }
  func.func @transform_5(%arg0: i32) -> (i32, i32, i32, i32) {
    %c0_i32 = arith.constant 0 : i32
    %c0_i32_0 = arith.constant 0 : i32
    %c0_i32_1 = arith.constant 0 : i32
    %c0_i32_2 = arith.constant 0 : i32
    return %arg0, %c0_i32, %c0_i32_0, %c0_i32_1 : i32, i32, i32, i32
  }
}

module attributes {stable_mosaic.version = 11 : i64} {
  func.func @_linear_kernel(%arg0: i32, %arg1: memref<6x24xf32, #tpu.memory_space<vmem>>, %arg2: memref<24x16xf32, #tpu.memory_space<vmem>>, %arg3: memref<1x16xf32, #tpu.memory_space<vmem>>, %arg4: memref<6x16xf32, #tpu.memory_space<vmem>>) attributes {dimension_semantics = [#tpu.dimension_semantics<parallel>], iteration_bounds = array<i64: 1>, scalar_prefetch = 0 : i64, scratch_operands = 0 : i64, tpu.core_type = #tpu.core_type<tc>, window_params = [{transform_indices = @transform_0, window_bounds = array<i64: 6, 24>}, {pipeline_mode = #tpu.pipeline_mode<synchronous>, transform_indices = @transform_1, window_bounds = array<i64: 24, 16>}, {pipeline_mode = #tpu.pipeline_mode<synchronous>, transform_indices = @transform_2, window_bounds = array<i64: 1, 16>}, {transform_indices = @transform_3, window_bounds = array<i64: 6, 16>}]} {
    %c0 = arith.constant 0 : index
    %c0_0 = arith.constant 0 : index
    %0 = vector.load %arg1[%c0, %c0_0] : memref<6x24xf32, #tpu.memory_space<vmem>>, vector<6x24xf32>
    %c0_1 = arith.constant 0 : index
    %c0_2 = arith.constant 0 : index
    %1 = vector.load %arg2[%c0_1, %c0_2] : memref<24x16xf32, #tpu.memory_space<vmem>>, vector<24x16xf32>
    %cst = arith.constant dense<0.000000e+00> : vector<6x16xf32>
    %2 = tpu.matmul %0, %1, %cst {dimension_numbers = #tpu.dot_dimension_numbers<[1], [0], [0], [1], [0, 0, 1, 1], [], []>} : vector<6x24xf32>, vector<24x16xf32>, vector<6x16xf32> -> vector<6x16xf32>
    %c0_3 = arith.constant 0 : index
    %c0_4 = arith.constant 0 : index
    %3 = vector.load %arg3[%c0_3, %c0_4] : memref<1x16xf32, #tpu.memory_space<vmem>>, vector<1x16xf32>
    %4 = vector.broadcast %3 : vector<1x16xf32> to vector<6x16xf32>
    %5 = arith.addf %2, %4 : vector<6x16xf32>
    %c0_5 = arith.constant 0 : index
    %c0_6 = arith.constant 0 : index
    %6 = vector.load %arg4[%c0_5, %c0_6] : memref<6x16xf32, #tpu.memory_space<vmem>>, vector<6x16xf32>
    tpu.vector_store %arg4[%c0_5, %c0_6], %5 {strides = array<i32>} : memref<6x16xf32, #tpu.memory_space<vmem>>, vector<6x16xf32>,
    return
  }
  func.func @transform_0(%arg0: i32) -> (i32, i32) {
    %c0_i32 = arith.constant 0 : i32
    %c0_i32_0 = arith.constant 0 : i32
    return %arg0, %c0_i32 : i32, i32
  }
  func.func @transform_1(%arg0: i32) -> (i32, i32) {
    %c0_i32 = arith.constant 0 : i32
    %c0_i32_0 = arith.constant 0 : i32
    %c0_i32_1 = arith.constant 0 : i32
    return %c0_i32, %c0_i32_0 : i32, i32
  }
  func.func @transform_2(%arg0: i32) -> (i32, i32) {
    %c0_i32 = arith.constant 0 : i32
    %c0_i32_0 = arith.constant 0 : i32
    %c0_i32_1 = arith.constant 0 : i32
    return %c0_i32, %c0_i32_0 : i32, i32
  }
  func.func @transform_3(%arg0: i32) -> (i32, i32) {
    %c0_i32 = arith.constant 0 : i32
    %c0_i32_0 = arith.constant 0 : i32
    return %arg0, %c0_i32 : i32, i32
  }
}

module attributes {stable_mosaic.version = 11 : i64} {
  func.func @_textcnn_ctx_kernel(%arg0: memref<2x16x8xf32, #tpu.memory_space<vmem>>, %arg1: memref<8x84xf32, #tpu.memory_space<vmem>>, %arg2: memref<1x24xf32, #tpu.memory_space<vmem>>, %arg3: memref<24x16xf32, #tpu.memory_space<vmem>>, %arg4: memref<1x16xf32, #tpu.memory_space<vmem>>, %arg5: memref<2x16xf32, #tpu.memory_space<vmem>>) attributes {dimension_semantics = [], scalar_prefetch = 0 : i64, scratch_operands = 0 : i64, tpu.core_type = #tpu.core_type<tc>} {
    %c0 = arith.constant 0 : index
    %c0_0 = arith.constant 0 : index
    %c0_1 = arith.constant 0 : index
    %0 = vector.load %arg0[%c0, %c0_0, %c0_1] : memref<2x16x8xf32, #tpu.memory_space<vmem>>, vector<2x16x8xf32>
    %1 = vector.shape_cast %0 : vector<2x16x8xf32> to vector<32x8xf32>
    %c0_2 = arith.constant 0 : index
    %c0_3 = arith.constant 0 : index
    %2 = vector.load %arg1[%c0_2, %c0_3] : memref<8x84xf32, #tpu.memory_space<vmem>>, vector<8x84xf32>
    %cst = arith.constant dense<0.000000e+00> : vector<32x84xf32>
    %3 = tpu.matmul %1, %2, %cst {dimension_numbers = #tpu.dot_dimension_numbers<[1], [0], [0], [1], [0, 0, 1, 1], [], []>} : vector<32x8xf32>, vector<8x84xf32>, vector<32x84xf32> -> vector<32x84xf32>
    %4 = vector.shape_cast %3 : vector<32x84xf32> to vector<2x16x84xf32>
    %c0_4 = arith.constant 0 : index
    %c0_5 = arith.constant 0 : index
    %5 = vector.load %arg2[%c0_4, %c0_5] : memref<1x24xf32, #tpu.memory_space<vmem>>, vector<1x24xf32>
    %6 = vector.extract_strided_slice %4 {offsets = [0, 0, 0], sizes = [2, 16, 4], strides = [1, 1, 1]} : vector<2x16x84xf32> to vector<2x16x4xf32>
    %7 = vector.extract_strided_slice %5 {offsets = [0, 0], sizes = [1, 4], strides = [1, 1]} : vector<1x24xf32> to vector<1x4xf32>
    %8 = vector.shape_cast %7 : vector<1x4xf32> to vector<1x1x4xf32>
    %9 = vector.broadcast %8 : vector<1x1x4xf32> to vector<2x16x4xf32>
    %10 = arith.addf %6, %9 : vector<2x16x4xf32>
    %cst_6 = arith.constant 0.000000e+00 : f32
    %11 = vector.broadcast %cst_6 : f32 to vector<2x16x4xf32>
    %12 = arith.maximumf %10, %11 : vector<2x16x4xf32>
    %cst_7 = arith.constant dense<0xFF800000> : vector<2x4xf32>
    %13 = vector.multi_reduction <maximumf>, %12, %cst_7 [1] : vector<2x16x4xf32> to vector<2x4xf32>
    %14 = vector.extract_strided_slice %4 {offsets = [0, 0, 4], sizes = [2, 15, 4], strides = [1, 1, 1]} : vector<2x16x84xf32> to vector<2x15x4xf32>
    %15 = vector.extract_strided_slice %4 {offsets = [0, 1, 8], sizes = [2, 15, 4], strides = [1, 1, 1]} : vector<2x16x84xf32> to vector<2x15x4xf32>
    %16 = arith.addf %14, %15 : vector<2x15x4xf32>
    %17 = vector.extract_strided_slice %5 {offsets = [0, 4], sizes = [1, 4], strides = [1, 1]} : vector<1x24xf32> to vector<1x4xf32>
    %18 = vector.shape_cast %17 : vector<1x4xf32> to vector<1x1x4xf32>
    %19 = vector.broadcast %18 : vector<1x1x4xf32> to vector<2x15x4xf32>
    %20 = arith.addf %16, %19 : vector<2x15x4xf32>
    %cst_8 = arith.constant 0.000000e+00 : f32
    %21 = vector.broadcast %cst_8 : f32 to vector<2x15x4xf32>
    %22 = arith.maximumf %20, %21 : vector<2x15x4xf32>
    %cst_9 = arith.constant dense<0xFF800000> : vector<2x4xf32>
    %23 = vector.multi_reduction <maximumf>, %22, %cst_9 [1] : vector<2x15x4xf32> to vector<2x4xf32>
    %24 = vector.extract_strided_slice %4 {offsets = [0, 0, 12], sizes = [2, 14, 4], strides = [1, 1, 1]} : vector<2x16x84xf32> to vector<2x14x4xf32>
    %25 = vector.extract_strided_slice %4 {offsets = [0, 1, 16], sizes = [2, 14, 4], strides = [1, 1, 1]} : vector<2x16x84xf32> to vector<2x14x4xf32>
    %26 = arith.addf %24, %25 : vector<2x14x4xf32>
    %27 = vector.extract_strided_slice %4 {offsets = [0, 2, 20], sizes = [2, 14, 4], strides = [1, 1, 1]} : vector<2x16x84xf32> to vector<2x14x4xf32>
    %28 = arith.addf %26, %27 : vector<2x14x4xf32>
    %29 = vector.extract_strided_slice %5 {offsets = [0, 8], sizes = [1, 4], strides = [1, 1]} : vector<1x24xf32> to vector<1x4xf32>
    %30 = vector.shape_cast %29 : vector<1x4xf32> to vector<1x1x4xf32>
    %31 = vector.broadcast %30 : vector<1x1x4xf32> to vector<2x14x4xf32>
    %32 = arith.addf %28, %31 : vector<2x14x4xf32>
    %cst_10 = arith.constant 0.000000e+00 : f32
    %33 = vector.broadcast %cst_10 : f32 to vector<2x14x4xf32>
    %34 = arith.maximumf %32, %33 : vector<2x14x4xf32>
    %cst_11 = arith.constant dense<0xFF800000> : vector<2x4xf32>
    %35 = vector.multi_reduction <maximumf>, %34, %cst_11 [1] : vector<2x14x4xf32> to vector<2x4xf32>
    %36 = vector.extract_strided_slice %4 {offsets = [0, 0, 24], sizes = [2, 13, 4], strides = [1, 1, 1]} : vector<2x16x84xf32> to vector<2x13x4xf32>
    %37 = vector.extract_strided_slice %4 {offsets = [0, 1, 28], sizes = [2, 13, 4], strides = [1, 1, 1]} : vector<2x16x84xf32> to vector<2x13x4xf32>
    %38 = arith.addf %36, %37 : vector<2x13x4xf32>
    %39 = vector.extract_strided_slice %4 {offsets = [0, 2, 32], sizes = [2, 13, 4], strides = [1, 1, 1]} : vector<2x16x84xf32> to vector<2x13x4xf32>
    %40 = arith.addf %38, %39 : vector<2x13x4xf32>
    %41 = vector.extract_strided_slice %4 {offsets = [0, 3, 36], sizes = [2, 13, 4], strides = [1, 1, 1]} : vector<2x16x84xf32> to vector<2x13x4xf32>
    %42 = arith.addf %40, %41 : vector<2x13x4xf32>
    %43 = vector.extract_strided_slice %5 {offsets = [0, 12], sizes = [1, 4], strides = [1, 1]} : vector<1x24xf32> to vector<1x4xf32>
    %44 = vector.shape_cast %43 : vector<1x4xf32> to vector<1x1x4xf32>
    %45 = vector.broadcast %44 : vector<1x1x4xf32> to vector<2x13x4xf32>
    %46 = arith.addf %42, %45 : vector<2x13x4xf32>
    %cst_12 = arith.constant 0.000000e+00 : f32
    %47 = vector.broadcast %cst_12 : f32 to vector<2x13x4xf32>
    %48 = arith.maximumf %46, %47 : vector<2x13x4xf32>
    %cst_13 = arith.constant dense<0xFF800000> : vector<2x4xf32>
    %49 = vector.multi_reduction <maximumf>, %48, %cst_13 [1] : vector<2x13x4xf32> to vector<2x4xf32>
    %50 = vector.extract_strided_slice %4 {offsets = [0, 0, 40], sizes = [2, 12, 4], strides = [1, 1, 1]} : vector<2x16x84xf32> to vector<2x12x4xf32>
    %51 = vector.extract_strided_slice %4 {offsets = [0, 1, 44], sizes = [2, 12, 4], strides = [1, 1, 1]} : vector<2x16x84xf32> to vector<2x12x4xf32>
    %52 = arith.addf %50, %51 : vector<2x12x4xf32>
    %53 = vector.extract_strided_slice %4 {offsets = [0, 2, 48], sizes = [2, 12, 4], strides = [1, 1, 1]} : vector<2x16x84xf32> to vector<2x12x4xf32>
    %54 = arith.addf %52, %53 : vector<2x12x4xf32>
    %55 = vector.extract_strided_slice %4 {offsets = [0, 3, 52], sizes = [2, 12, 4], strides = [1, 1, 1]} : vector<2x16x84xf32> to vector<2x12x4xf32>
    %56 = arith.addf %54, %55 : vector<2x12x4xf32>
    %57 = vector.extract_strided_slice %4 {offsets = [0, 4, 56], sizes = [2, 12, 4], strides = [1, 1, 1]} : vector<2x16x84xf32> to vector<2x12x4xf32>
    %58 = arith.addf %56, %57 : vector<2x12x4xf32>
    %59 = vector.extract_strided_slice %5 {offsets = [0, 16], sizes = [1, 4], strides = [1, 1]} : vector<1x24xf32> to vector<1x4xf32>
    %60 = vector.shape_cast %59 : vector<1x4xf32> to vector<1x1x4xf32>
    %61 = vector.broadcast %60 : vector<1x1x4xf32> to vector<2x12x4xf32>
    %62 = arith.addf %58, %61 : vector<2x12x4xf32>
    %cst_14 = arith.constant 0.000000e+00 : f32
    %63 = vector.broadcast %cst_14 : f32 to vector<2x12x4xf32>
    %64 = arith.maximumf %62, %63 : vector<2x12x4xf32>
    %cst_15 = arith.constant dense<0xFF800000> : vector<2x4xf32>
    %65 = vector.multi_reduction <maximumf>, %64, %cst_15 [1] : vector<2x12x4xf32> to vector<2x4xf32>
    %66 = vector.extract_strided_slice %4 {offsets = [0, 0, 60], sizes = [2, 11, 4], strides = [1, 1, 1]} : vector<2x16x84xf32> to vector<2x11x4xf32>
    %67 = vector.extract_strided_slice %4 {offsets = [0, 1, 64], sizes = [2, 11, 4], strides = [1, 1, 1]} : vector<2x16x84xf32> to vector<2x11x4xf32>
    %68 = arith.addf %66, %67 : vector<2x11x4xf32>
    %69 = vector.extract_strided_slice %4 {offsets = [0, 2, 68], sizes = [2, 11, 4], strides = [1, 1, 1]} : vector<2x16x84xf32> to vector<2x11x4xf32>
    %70 = arith.addf %68, %69 : vector<2x11x4xf32>
    %71 = vector.extract_strided_slice %4 {offsets = [0, 3, 72], sizes = [2, 11, 4], strides = [1, 1, 1]} : vector<2x16x84xf32> to vector<2x11x4xf32>
    %72 = arith.addf %70, %71 : vector<2x11x4xf32>
    %73 = vector.extract_strided_slice %4 {offsets = [0, 4, 76], sizes = [2, 11, 4], strides = [1, 1, 1]} : vector<2x16x84xf32> to vector<2x11x4xf32>
    %74 = arith.addf %72, %73 : vector<2x11x4xf32>
    %75 = vector.extract_strided_slice %4 {offsets = [0, 5, 80], sizes = [2, 11, 4], strides = [1, 1, 1]} : vector<2x16x84xf32> to vector<2x11x4xf32>
    %76 = arith.addf %74, %75 : vector<2x11x4xf32>
    %77 = vector.extract_strided_slice %5 {offsets = [0, 20], sizes = [1, 4], strides = [1, 1]} : vector<1x24xf32> to vector<1x4xf32>
    %78 = vector.shape_cast %77 : vector<1x4xf32> to vector<1x1x4xf32>
    %79 = vector.broadcast %78 : vector<1x1x4xf32> to vector<2x11x4xf32>
    %80 = arith.addf %76, %79 : vector<2x11x4xf32>
    %cst_16 = arith.constant 0.000000e+00 : f32
    %81 = vector.broadcast %cst_16 : f32 to vector<2x11x4xf32>
    %82 = arith.maximumf %80, %81 : vector<2x11x4xf32>
    %cst_17 = arith.constant dense<0xFF800000> : vector<2x4xf32>
    %83 = vector.multi_reduction <maximumf>, %82, %cst_17 [1] : vector<2x11x4xf32> to vector<2x4xf32>
    %84 = tpu.concatenate %13, %23, %35, %49, %65, %83 in 1 : vector<2x4xf32>, vector<2x4xf32>, vector<2x4xf32>, vector<2x4xf32>, vector<2x4xf32>, vector<2x4xf32> -> vector<2x24xf32>
    %c0_18 = arith.constant 0 : index
    %c0_19 = arith.constant 0 : index
    %85 = vector.load %arg3[%c0_18, %c0_19] : memref<24x16xf32, #tpu.memory_space<vmem>>, vector<24x16xf32>
    %cst_20 = arith.constant dense<0.000000e+00> : vector<2x16xf32>
    %86 = tpu.matmul %84, %85, %cst_20 {dimension_numbers = #tpu.dot_dimension_numbers<[1], [0], [0], [1], [0, 0, 1, 1], [], []>} : vector<2x24xf32>, vector<24x16xf32>, vector<2x16xf32> -> vector<2x16xf32>
    %c0_21 = arith.constant 0 : index
    %c0_22 = arith.constant 0 : index
    %87 = vector.load %arg4[%c0_21, %c0_22] : memref<1x16xf32, #tpu.memory_space<vmem>>, vector<1x16xf32>
    %88 = vector.broadcast %87 : vector<1x16xf32> to vector<2x16xf32>
    %89 = arith.addf %86, %88 : vector<2x16xf32>
    %c0_23 = arith.constant 0 : index
    %c0_24 = arith.constant 0 : index
    %90 = vector.load %arg5[%c0_23, %c0_24] : memref<2x16xf32, #tpu.memory_space<vmem>>, vector<2x16xf32>
    tpu.vector_store %arg5[%c0_23, %c0_24], %89 {strides = array<i32>} : memref<2x16xf32, #tpu.memory_space<vmem>>, vector<2x16xf32>,
    return
  }
}

module attributes {stable_mosaic.version = 11 : i64} {
  func.func @_linear_kernel(%arg0: i32, %arg1: memref<10x24xf32, #tpu.memory_space<vmem>>, %arg2: memref<24x16xf32, #tpu.memory_space<vmem>>, %arg3: memref<1x16xf32, #tpu.memory_space<vmem>>, %arg4: memref<10x16xf32, #tpu.memory_space<vmem>>) attributes {dimension_semantics = [#tpu.dimension_semantics<parallel>], iteration_bounds = array<i64: 1>, scalar_prefetch = 0 : i64, scratch_operands = 0 : i64, tpu.core_type = #tpu.core_type<tc>, window_params = [{transform_indices = @transform_0, window_bounds = array<i64: 10, 24>}, {pipeline_mode = #tpu.pipeline_mode<synchronous>, transform_indices = @transform_1, window_bounds = array<i64: 24, 16>}, {pipeline_mode = #tpu.pipeline_mode<synchronous>, transform_indices = @transform_2, window_bounds = array<i64: 1, 16>}, {transform_indices = @transform_3, window_bounds = array<i64: 10, 16>}]} {
    %c0 = arith.constant 0 : index
    %c0_0 = arith.constant 0 : index
    %0 = vector.load %arg1[%c0, %c0_0] : memref<10x24xf32, #tpu.memory_space<vmem>>, vector<10x24xf32>
    %c0_1 = arith.constant 0 : index
    %c0_2 = arith.constant 0 : index
    %1 = vector.load %arg2[%c0_1, %c0_2] : memref<24x16xf32, #tpu.memory_space<vmem>>, vector<24x16xf32>
    %cst = arith.constant dense<0.000000e+00> : vector<10x16xf32>
    %2 = tpu.matmul %0, %1, %cst {dimension_numbers = #tpu.dot_dimension_numbers<[1], [0], [0], [1], [0, 0, 1, 1], [], []>} : vector<10x24xf32>, vector<24x16xf32>, vector<10x16xf32> -> vector<10x16xf32>
    %c0_3 = arith.constant 0 : index
    %c0_4 = arith.constant 0 : index
    %3 = vector.load %arg3[%c0_3, %c0_4] : memref<1x16xf32, #tpu.memory_space<vmem>>, vector<1x16xf32>
    %4 = vector.broadcast %3 : vector<1x16xf32> to vector<10x16xf32>
    %5 = arith.addf %2, %4 : vector<10x16xf32>
    %6 = math.tanh %5 : vector<10x16xf32>
    %7 = math.tanh %6 : vector<10x16xf32>
    %c0_5 = arith.constant 0 : index
    %c0_6 = arith.constant 0 : index
    %8 = vector.load %arg4[%c0_5, %c0_6] : memref<10x16xf32, #tpu.memory_space<vmem>>, vector<10x16xf32>
    tpu.vector_store %arg4[%c0_5, %c0_6], %7 {strides = array<i32>} : memref<10x16xf32, #tpu.memory_space<vmem>>, vector<10x16xf32>,
    return
  }
  func.func @transform_0(%arg0: i32) -> (i32, i32) {
    %c0_i32 = arith.constant 0 : i32
    %c0_i32_0 = arith.constant 0 : i32
    return %arg0, %c0_i32 : i32, i32
  }
  func.func @transform_1(%arg0: i32) -> (i32, i32) {
    %c0_i32 = arith.constant 0 : i32
    %c0_i32_0 = arith.constant 0 : i32
    %c0_i32_1 = arith.constant 0 : i32
    return %c0_i32, %c0_i32_0 : i32, i32
  }
  func.func @transform_2(%arg0: i32) -> (i32, i32) {
    %c0_i32 = arith.constant 0 : i32
    %c0_i32_0 = arith.constant 0 : i32
    %c0_i32_1 = arith.constant 0 : i32
    return %c0_i32, %c0_i32_0 : i32, i32
  }
  func.func @transform_3(%arg0: i32) -> (i32, i32) {
    %c0_i32 = arith.constant 0 : i32
    %c0_i32_0 = arith.constant 0 : i32
    return %arg0, %c0_i32 : i32, i32
  }
}

module attributes {stable_mosaic.version = 11 : i64} {
  func.func @_attn_ctx_kernel(%arg0: memref<4x3x16xf32, #tpu.memory_space<vmem>>, %arg1: memref<4x16xf32, #tpu.memory_space<vmem>>, %arg2: memref<12x4xf32, #tpu.memory_space<vmem>>, %arg3: memref<16x16xf32, #tpu.memory_space<vmem>>, %arg4: memref<1x16xf32, #tpu.memory_space<vmem>>, %arg5: memref<16x16xf32, #tpu.memory_space<vmem>>, %arg6: memref<1x16xf32, #tpu.memory_space<vmem>>, %arg7: memref<16x1xf32, #tpu.memory_space<vmem>>, %arg8: memref<4x16xf32, #tpu.memory_space<vmem>>) attributes {dimension_semantics = [], scalar_prefetch = 0 : i64, scratch_operands = 0 : i64, tpu.core_type = #tpu.core_type<tc>} {
    %c0 = arith.constant 0 : index
    %c0_0 = arith.constant 0 : index
    %c0_1 = arith.constant 0 : index
    %0 = vector.load %arg0[%c0, %c0_0, %c0_1] : memref<4x3x16xf32, #tpu.memory_space<vmem>>, vector<4x3x16xf32>
    %1 = vector.shape_cast %0 : vector<4x3x16xf32> to vector<12x16xf32>
    %c0_2 = arith.constant 0 : index
    %c0_3 = arith.constant 0 : index
    %2 = vector.load %arg3[%c0_2, %c0_3] : memref<16x16xf32, #tpu.memory_space<vmem>>, vector<16x16xf32>
    %cst = arith.constant dense<0.000000e+00> : vector<12x16xf32>
    %3 = tpu.matmul %1, %2, %cst {dimension_numbers = #tpu.dot_dimension_numbers<[1], [0], [0], [1], [0, 0, 1, 1], [], []>} : vector<12x16xf32>, vector<16x16xf32>, vector<12x16xf32> -> vector<12x16xf32>
    %c0_4 = arith.constant 0 : index
    %c0_5 = arith.constant 0 : index
    %4 = vector.load %arg4[%c0_4, %c0_5] : memref<1x16xf32, #tpu.memory_space<vmem>>, vector<1x16xf32>
    %5 = vector.broadcast %4 : vector<1x16xf32> to vector<12x16xf32>
    %6 = arith.addf %3, %5 : vector<12x16xf32>
    %c0_6 = arith.constant 0 : index
    %c0_7 = arith.constant 0 : index
    %7 = vector.load %arg1[%c0_6, %c0_7] : memref<4x16xf32, #tpu.memory_space<vmem>>, vector<4x16xf32>
    %c0_8 = arith.constant 0 : index
    %c0_9 = arith.constant 0 : index
    %8 = vector.load %arg5[%c0_8, %c0_9] : memref<16x16xf32, #tpu.memory_space<vmem>>, vector<16x16xf32>
    %cst_10 = arith.constant dense<0.000000e+00> : vector<4x16xf32>
    %9 = tpu.matmul %7, %8, %cst_10 {dimension_numbers = #tpu.dot_dimension_numbers<[1], [0], [0], [1], [0, 0, 1, 1], [], []>} : vector<4x16xf32>, vector<16x16xf32>, vector<4x16xf32> -> vector<4x16xf32>
    %c0_11 = arith.constant 0 : index
    %c0_12 = arith.constant 0 : index
    %10 = vector.load %arg6[%c0_11, %c0_12] : memref<1x16xf32, #tpu.memory_space<vmem>>, vector<1x16xf32>
    %11 = vector.broadcast %10 : vector<1x16xf32> to vector<4x16xf32>
    %12 = arith.addf %9, %11 : vector<4x16xf32>
    %c0_13 = arith.constant 0 : index
    %c0_14 = arith.constant 0 : index
    %13 = vector.load %arg2[%c0_13, %c0_14] : memref<12x4xf32, #tpu.memory_space<vmem>>, vector<12x4xf32>
    %cst_15 = arith.constant dense<0.000000e+00> : vector<12x16xf32>
    %14 = tpu.matmul %13, %12, %cst_15 {dimension_numbers = #tpu.dot_dimension_numbers<[1], [0], [0], [1], [0, 0, 1, 1], [], []>} : vector<12x4xf32>, vector<4x16xf32>, vector<12x16xf32> -> vector<12x16xf32>
    %15 = arith.addf %6, %14 : vector<12x16xf32>
    %16 = math.tanh %15 : vector<12x16xf32>
    %c0_16 = arith.constant 0 : index
    %c0_17 = arith.constant 0 : index
    %17 = vector.load %arg7[%c0_16, %c0_17] : memref<16x1xf32, #tpu.memory_space<vmem>>, vector<16x1xf32>
    %cst_18 = arith.constant dense<0.000000e+00> : vector<12x1xf32>
    %18 = tpu.matmul %16, %17, %cst_18 {dimension_numbers = #tpu.dot_dimension_numbers<[1], [0], [0], [1], [0, 0, 1, 1], [], []>} : vector<12x16xf32>, vector<16x1xf32>, vector<12x1xf32> -> vector<12x1xf32>
    %19 = vector.shape_cast %18 : vector<12x1xf32> to vector<4x3xf32>
    %cst_19 = arith.constant dense<0xFF800000> : vector<4xf32>
    %20 = vector.multi_reduction <maximumf>, %19, %cst_19 [1] : vector<4x3xf32> to vector<4xf32>
    %21 = vector.shape_cast %20 : vector<4xf32> to vector<4x1xf32>
    %22 = vector.broadcast %21 : vector<4x1xf32> to vector<4x3xf32>
    %23 = arith.subf %19, %22 : vector<4x3xf32>
    %24 = math.exp %23 : vector<4x3xf32>
    %cst_20 = arith.constant dense<0.000000e+00> : vector<4xf32>
    %25 = vector.multi_reduction <add>, %24, %cst_20 [1] : vector<4x3xf32> to vector<4xf32>
    %26 = vector.shape_cast %25 : vector<4xf32> to vector<4x1xf32>
    %27 = tpu.reciprocal %26 {approx = true} : vector<4x1xf32> -> vector<4x1xf32>
    %28 = vector.broadcast %27 : vector<4x1xf32> to vector<4x3xf32>
    %29 = arith.mulf %24, %28 : vector<4x3xf32>
    %30 = vector.shape_cast %29 : vector<4x3xf32> to vector<4x3x1xf32>
    %31 = vector.broadcast %30 : vector<4x3x1xf32> to vector<4x3x16xf32>
    %32 = arith.mulf %31, %0 : vector<4x3x16xf32>
    %cst_21 = arith.constant dense<0.000000e+00> : vector<4x16xf32>
    %33 = vector.multi_reduction <add>, %32, %cst_21 [1] : vector<4x3x16xf32> to vector<4x16xf32>
    %c0_22 = arith.constant 0 : index
    %c0_23 = arith.constant 0 : index
    %34 = vector.load %arg8[%c0_22, %c0_23] : memref<4x16xf32, #tpu.memory_space<vmem>>, vector<4x16xf32>
    tpu.vector_store %arg8[%c0_22, %c0_23], %33 {strides = array<i32>} : memref<4x16xf32, #tpu.memory_space<vmem>>, vector<4x16xf32>,
    return
  }
}

module attributes {stable_mosaic.version = 11 : i64} {
  func.func @_attn_ctx_kernel(%arg0: memref<4x4x16xf32, #tpu.memory_space<vmem>>, %arg1: memref<4x16xf32, #tpu.memory_space<vmem>>, %arg2: memref<16x4xf32, #tpu.memory_space<vmem>>, %arg3: memref<16x16xf32, #tpu.memory_space<vmem>>, %arg4: memref<1x16xf32, #tpu.memory_space<vmem>>, %arg5: memref<16x16xf32, #tpu.memory_space<vmem>>, %arg6: memref<1x16xf32, #tpu.memory_space<vmem>>, %arg7: memref<16x1xf32, #tpu.memory_space<vmem>>, %arg8: memref<4x16xf32, #tpu.memory_space<vmem>>) attributes {dimension_semantics = [], scalar_prefetch = 0 : i64, scratch_operands = 0 : i64, tpu.core_type = #tpu.core_type<tc>} {
    %c0 = arith.constant 0 : index
    %c0_0 = arith.constant 0 : index
    %c0_1 = arith.constant 0 : index
    %0 = vector.load %arg0[%c0, %c0_0, %c0_1] : memref<4x4x16xf32, #tpu.memory_space<vmem>>, vector<4x4x16xf32>
    %1 = vector.shape_cast %0 : vector<4x4x16xf32> to vector<16x16xf32>
    %c0_2 = arith.constant 0 : index
    %c0_3 = arith.constant 0 : index
    %2 = vector.load %arg3[%c0_2, %c0_3] : memref<16x16xf32, #tpu.memory_space<vmem>>, vector<16x16xf32>
    %cst = arith.constant dense<0.000000e+00> : vector<16x16xf32>
    %3 = tpu.matmul %1, %2, %cst {dimension_numbers = #tpu.dot_dimension_numbers<[1], [0], [0], [1], [0, 0, 1, 1], [], []>} : vector<16x16xf32>, vector<16x16xf32>, vector<16x16xf32> -> vector<16x16xf32>
    %c0_4 = arith.constant 0 : index
    %c0_5 = arith.constant 0 : index
    %4 = vector.load %arg4[%c0_4, %c0_5] : memref<1x16xf32, #tpu.memory_space<vmem>>, vector<1x16xf32>
    %5 = vector.broadcast %4 : vector<1x16xf32> to vector<16x16xf32>
    %6 = arith.addf %3, %5 : vector<16x16xf32>
    %c0_6 = arith.constant 0 : index
    %c0_7 = arith.constant 0 : index
    %7 = vector.load %arg1[%c0_6, %c0_7] : memref<4x16xf32, #tpu.memory_space<vmem>>, vector<4x16xf32>
    %c0_8 = arith.constant 0 : index
    %c0_9 = arith.constant 0 : index
    %8 = vector.load %arg5[%c0_8, %c0_9] : memref<16x16xf32, #tpu.memory_space<vmem>>, vector<16x16xf32>
    %cst_10 = arith.constant dense<0.000000e+00> : vector<4x16xf32>
    %9 = tpu.matmul %7, %8, %cst_10 {dimension_numbers = #tpu.dot_dimension_numbers<[1], [0], [0], [1], [0, 0, 1, 1], [], []>} : vector<4x16xf32>, vector<16x16xf32>, vector<4x16xf32> -> vector<4x16xf32>
    %c0_11 = arith.constant 0 : index
    %c0_12 = arith.constant 0 : index
    %10 = vector.load %arg6[%c0_11, %c0_12] : memref<1x16xf32, #tpu.memory_space<vmem>>, vector<1x16xf32>
    %11 = vector.broadcast %10 : vector<1x16xf32> to vector<4x16xf32>
    %12 = arith.addf %9, %11 : vector<4x16xf32>
    %c0_13 = arith.constant 0 : index
    %c0_14 = arith.constant 0 : index
    %13 = vector.load %arg2[%c0_13, %c0_14] : memref<16x4xf32, #tpu.memory_space<vmem>>, vector<16x4xf32>
    %cst_15 = arith.constant dense<0.000000e+00> : vector<16x16xf32>
    %14 = tpu.matmul %13, %12, %cst_15 {dimension_numbers = #tpu.dot_dimension_numbers<[1], [0], [0], [1], [0, 0, 1, 1], [], []>} : vector<16x4xf32>, vector<4x16xf32>, vector<16x16xf32> -> vector<16x16xf32>
    %15 = arith.addf %6, %14 : vector<16x16xf32>
    %16 = math.tanh %15 : vector<16x16xf32>
    %c0_16 = arith.constant 0 : index
    %c0_17 = arith.constant 0 : index
    %17 = vector.load %arg7[%c0_16, %c0_17] : memref<16x1xf32, #tpu.memory_space<vmem>>, vector<16x1xf32>
    %cst_18 = arith.constant dense<0.000000e+00> : vector<16x1xf32>
    %18 = tpu.matmul %16, %17, %cst_18 {dimension_numbers = #tpu.dot_dimension_numbers<[1], [0], [0], [1], [0, 0, 1, 1], [], []>} : vector<16x16xf32>, vector<16x1xf32>, vector<16x1xf32> -> vector<16x1xf32>
    %19 = vector.shape_cast %18 : vector<16x1xf32> to vector<4x4xf32>
    %cst_19 = arith.constant dense<0xFF800000> : vector<4xf32>
    %20 = vector.multi_reduction <maximumf>, %19, %cst_19 [1] : vector<4x4xf32> to vector<4xf32>
    %21 = vector.shape_cast %20 : vector<4xf32> to vector<4x1xf32>
    %22 = vector.broadcast %21 : vector<4x1xf32> to vector<4x4xf32>
    %23 = arith.subf %19, %22 : vector<4x4xf32>
    %24 = math.exp %23 : vector<4x4xf32>
    %cst_20 = arith.constant dense<0.000000e+00> : vector<4xf32>
    %25 = vector.multi_reduction <add>, %24, %cst_20 [1] : vector<4x4xf32> to vector<4xf32>
    %26 = vector.shape_cast %25 : vector<4xf32> to vector<4x1xf32>
    %27 = tpu.reciprocal %26 {approx = true} : vector<4x1xf32> -> vector<4x1xf32>
    %28 = vector.broadcast %27 : vector<4x1xf32> to vector<4x4xf32>
    %29 = arith.mulf %24, %28 : vector<4x4xf32>
    %30 = vector.shape_cast %29 : vector<4x4xf32> to vector<4x4x1xf32>
    %31 = vector.broadcast %30 : vector<4x4x1xf32> to vector<4x4x16xf32>
    %32 = arith.mulf %31, %0 : vector<4x4x16xf32>
    %cst_21 = arith.constant dense<0.000000e+00> : vector<4x16xf32>
    %33 = vector.multi_reduction <add>, %32, %cst_21 [1] : vector<4x4x16xf32> to vector<4x16xf32>
    %c0_22 = arith.constant 0 : index
    %c0_23 = arith.constant 0 : index
    %34 = vector.load %arg8[%c0_22, %c0_23] : memref<4x16xf32, #tpu.memory_space<vmem>>, vector<4x16xf32>
    tpu.vector_store %arg8[%c0_22, %c0_23], %33 {strides = array<i32>} : memref<4x16xf32, #tpu.memory_space<vmem>>, vector<4x16xf32>,
    return
  }
}

</mosaic_0001>

<bundles_post_ra>
// kernel: _lambda_.11
= control target key start
LH: loop header
LB: loop body
LE: loop exit
PB: predicated region body
PF: predicated region fallthrough
CT: control target
= control target key end

     0   :  { %v122_v0 = vmov 0.0   ;;  %vm123_vm0 = vmmov 0   ;;  %vm25_vm1 = vcmask 195584   ;;  %vm99_vm2 = vcmask 128000   ;;  %s162_s1 = inlined_call_operand.vmem [shape: f32[24,16], index: 1, kind: input, shape index: {}]   ;;  %s163_s0 = inlined_call_operand.vmem [shape: f32[6,24], index: 0, kind: input, shape index: {}]   ;;  %s164_s2 = inlined_call_operand.vmem [shape: f32[1,16], index: 2, kind: input, shape index: {}]   ;;  %s165_s3 = inlined_call_operand.vmem [shape: f32[6,16], index: 3, kind: output, shape index: {}]  }
   0x1   :  { %111 = vmatprep.subr.mxu0 %v122_v0  ;;  %v17_v1 = vld [vmem:[%s162_s1 + $0x10] sm:$0xff]  ;;  %v16_v2 = vld [vmem:[%s162_s1 + $0x8] sm:$0xff]  ;;  %117 = vmatprep.mubr.msk.f32.mxu0 %vm123_vm0, %v122_v0  ;;  %v15_v3 = vld [vmem:[%s162_s1] sm:$0xff] }
   0x2   :  { %112 = vmatpush3.msra.mxu0 %v17_v1  ;;  %v14_v4 = vld [vmem:[%s163_s0] sm:$0x3f] }
   0x3   :  { %113 = vmatprep.subr.mxu0 %v122_v0  ;;  %v105_v5 = vld [vmem:[%s164_s2] ss:$0 sm:$0xff] }
   0x4   :  { %114 = vmatpush3.msra.mxu0 %v16_v2 }
   0x5   :  { %115 = vmatprep.subr.mxu0 %v122_v0 }
   0x6   :  { %116 = vmatpush3.msra.mxu0 %v15_v3 }
   0x7   :  { %118 = vmatmul.mubr.msk.f32.vlgmr.msra.gmra.mxu0 %vm25_vm1, %v14_v4 }
  0xc7   :  { %v95_v6 = vpop.f32.mrf.mxu0 }
  0xc8   :  { %v96_v7 = vadd.f32 %v105_v5, %v95_v6 }
  0xc9   :  { %v119_v8 = vpop.f32.mrf.mxu0 }
  0xca   :  { %100 = vst.msk [vmem:[%s165_s3] sm:$0x3f] %vm99_vm2, %v96_v7 }

// kernel: _lambda_.10
= control target key start
LH: loop header
LB: loop body
LE: loop exit
PB: predicated region body
PF: predicated region fallthrough
CT: control target
= control target key end

     0   :  { %s956_s18 = smov 0   ;;  %s1039_s0 = inlined_call_operand.vmem [shape: f32[2,2,3,24], index: 0, kind: input, shape index: {}]   ;;  %s1040_s1 = inlined_call_operand.vmem [shape: f32[2,24,36], index: 1, kind: input, shape index: {}]   ;;  %s1041_s2 = inlined_call_operand.vmem [shape: f32[2,1,36], index: 2, kind: input, shape index: {}]   ;;  %s1042_s3 = inlined_call_operand.vmem [shape: f32[2,12,36], index: 3, kind: input, shape index: {}]   ;;  %s1043_s4 = inlined_call_operand.vmem [shape: f32[2,1,36], index: 4, kind: input, shape index: {}]   ;;  %s1044_s5 = inlined_call_operand.vmem [shape: f32[2,2,3,12], index: 5, kind: output, shape index: {}]  }
   0x1 LB: > { %s806_s19 = sadd.s32 4294967295, %s908_s18   ;;  %p810_p0 = scmp.ge.s32.totalorder %s908_s18, 1  ;;  %s908_s18 = sphi %s956_s18, %s15_s18  }
   0x2   : > { %p223_p1 = scmp.lt.s32.totalorder %s908_s18, 3 }
   0x4   : > { %p224_p2 = pnand %p810_p0, %p223_p1 }
   0x5   : > { %p267_p3 = scmp.lt.s32.totalorder (!%p224_p2), %s806_s19, 1  ;;  %s1020_s16 = smov (!%p224_p2), 0  }
   0x6   : > { %227 = sbr.rel (%p224_p2) target bundleno = 1039 (0x40f), region = 40 }
   0xb   : > { %v308_v0 = vlaneseq  ;;  %v918_v1 = vmov 0.0   ;;  %vm919_vm0 = vmmov 0   ;;  %v920_v2 = vmov 1966171168   ;;  %s1046_s19 = smov (!%p267_p3, %s806_s19), 1 }
   0xc   : > { %839 = vmatprep.subr.mxu0 %v918_v1  ;;  %845 = vmatprep.mubr.msk.f32.mxu0 %vm919_vm0, %v918_v1  ;;  %v306_v3 = vunpack.c.l.s4 %v920_v2  ;;  %s855_s20 = smul.u32 24, %s1046_s19  ;;  %s830_s21 = sshll.u32 %s1046_s19, 4  ;;  %vm393_vm1 = vcmask 195584   ;;  %vm562_vm2 = vcmask 288768   ;;  %v910_v58 = vmov 0.0  }
   0xd   : > { %v309_v4 = vshrl.u32 %v308_v0, 7  ;;  %s284_s24 = scalar_lea.vmem %s1042_s3, %s830_s21  ;;  %s287_s27 = scalar_lea.vmem %s1043_s4, %s1046_s19 }
   0xe   : > { %v307_v5 = vunpack.c.0.s8 %v306_v3  ;;  %s276_s30 = scalar_lea.vmem %s1040_s1, %s855_s20  ;;  %v980_v7 = vld [vmem:[%s284_s24] sm:$0xff]  ;;  %v982_v8 = vld [vmem:[%s284_s24 + $0x8] sm:$0xf]  ;;  %s829_s6 = sshll.u32 %s1046_s19, 3 }
   0xf   : > { %v984_v9 = vld [vmem:[%s287_s27] ss:$0 sm:$0xff]  ;;  %v345_v10 = vld [vmem:[%s276_s30 + $0x10] sm:$0xff]  ;;  %v344_v11 = vld [vmem:[%s276_s30 + $0x8] sm:$0xff]  ;;  %s271_s9 = scalar_lea.vmem %s1039_s0, %s829_s6  ;;  %s993_s12 = scalar_lea.vmem %s1044_s5, %s829_s6 }
  0x10   : > { %v975_v6 = vsub.s32 %v307_v5, %v309_v4  ;;  %840 = vmatpush3.msra.mxu0 %v345_v10  ;;  %v818_v12 = vld.sshfl [vmem:[%s271_s9] sm:$0x13 pattern:$0x75316420]  ;;  %s279_s15 = scalar_lea.vmem %s1041_s2, %s1046_s19 }
  0x11   : > { %841 = vmatprep.subr.mxu0 %v918_v1  ;;  %v343_v13 = vld [vmem:[%s276_s30] sm:$0xff]  ;;  %v304_v15 = vcombine.high %v818_v12, %v818_v12 }
  0x12   : > { %v819_v14 = vld.sshfl [vmem:[%s271_s9 + $0x4] sm:$0x13 pattern:$0x75316420]  ;;  %v311_v16 = vrot.slane %v818_v12, %v975_v6  ;;  %842 = vmatpush3.msra.mxu0 %v344_v11  ;;  %v820_v33 = vld [vmem:[%s279_s15] ss:$0 sm:$0xff] }
  0x13   : > { %v327_v17 = vcombine.high %v819_v14, %v819_v14  ;;  %v334_v18 = vrot.slane %v819_v14, %v975_v6  ;;  %843 = vmatprep.subr.mxu0 %v918_v1  ;;  %v318_v19 = vrot.slane %v304_v15, %v975_v6 }
  0x14   : > { %v319_v20 = vcombine.high %v311_v16, %v311_v16  ;;  %844 = vmatpush3.msra.mxu0 %v343_v13 }
  0x15   : > { %v341_v21 = vrot.slane %v327_v17, %v975_v6  ;;  %v342_v22 = vcombine.high %v334_v18, %v334_v18  ;;  %v353_v23 = vcombine.low %v311_v16, %v318_v19 }
  0x16   : > { %v354_v24 = vcombine.low %v319_v20, %v334_v18 }
  0x17   : > { %v355_v25 = vcombine.low %v341_v21, %v342_v22  ;;  %v362_v26 = vrot.slane %v353_v23, %v975_v6 }
  0x18   : > { %v369_v27 = vrot.slane %v354_v24, %v975_v6 }
  0x19   : > { %v376_v28 = vrot.slane %v355_v25, %v975_v6 }
  0x1a   : > { %v377_v29 = vcombine.low %v362_v26, %v369_v27 }
  0x1b   : > { %v391_v30 = vrot.slane %v376_v28, %v975_v6 }
  0x1c   : > { %v384_v31 = vrot.slane %v377_v29, %v975_v6 }
  0x1e   : > { %v392_v32 = vcombine.low %v384_v31, %v391_v30 }
  0x20   : > { %846 = vmatmul.mubr.msk.f32.vlgmr.msra.gmra.mxu0 %vm393_vm1, %v392_v32 }
  0xe0   : > { %v462_v34 = vpop.f32.mrf.mxu0 }
  0xe1   : > { %v463_v35 = vadd.f32 %v820_v33, %v462_v34 }
  0xe2   : > { %v847_v36 = vpop.f32.mrf.mxu0 }
  0xe3   : > { %v467_v37 = vcombine.high %v463_v35, %v463_v35  ;;  %v474_v38 = vrot.slane %v463_v35, %v975_v6 }
  0xe5   : > { %v481_v39 = vrot.slane %v467_v37, %v975_v6  ;;  %v482_v40 = vcombine.high %v474_v38, %v474_v38  ;;  %v490_v41 = vrot.slane %v474_v38, %v975_v6 }
  0xe7   : > { %v483_v42 = vcombine.high %v481_v39, %v481_v39  ;;  %v504_v43 = vrot.slane %v482_v40, %v975_v6  ;;  %v512_v44 = vcombine.high %v490_v41, %v490_v41  ;;  %v497_v45 = vrot.slane %v481_v39, %v975_v6 }
  0xe9   : > { %v511_v46 = vrot.slane %v483_v42, %v975_v6  ;;  %v513_v47 = vcombine.high %v504_v43, %v504_v43  ;;  %v514_v48 = vcombine.low %v490_v41, %v504_v43  ;;  %v528_v50 = vrot.slane %v512_v44, %v975_v6 }
  0xeb   : > { %v521_v49 = vrot.slane %v514_v48, %v975_v6  ;;  %v537_v51 = vcombine.low %v513_v47, %v497_v45  ;;  %v551_v54 = vrot.slane %v511_v46, %v975_v6 }
  0xed   : > { %v529_v52 = vcombine.low %v521_v49, %v528_v50  ;;  %v544_v53 = vrot.slane %v537_v51, %v975_v6 }
  0xef   : > { %v536_v55 = vrot.slane %v529_v52, %v975_v6  ;;  %v552_v56 = vcombine.low %v544_v53, %v551_v54 }
  0xf1   : > { %v559_v57 = vrot.slane %v552_v56, %v975_v6  ;;  %563 = vst.msk [vmem:[#allocation2] sm:$0x7] %vm562_vm2, %v536_v55 }
  0xf3   : > { %564 = vst.msk [vmem:[#allocation2 + $0x4] sm:$0x7] %vm562_vm2, %v559_v57 }
  0xf4 LB: >> { %vm587_vm3 = vcmask 1043456   ;;  %v921_v59 = vmov 0.0   ;;  %vm922_vm4 = vmmov 0   ;;  %s923_s17 = smov 116   ;;  %vm584_vm5 = vcmask 97280   ;;  %s924_s19 = smov 104   ;;  %s916_s16 = sphi %s1020_s16, %s573_s16   ;;  %v912_v58 = vphi %v910_v58, %v689_v58  }
  0xf5   : >> { %848 = vmatprep.subr.mxu0 %v921_v59  ;;  %852 = vmatprep.mubr.msk.f32.mxu0 %vm922_vm4, %v921_v59  ;;  %s825_s20 = sshll.u32 %s916_s16, 2  ;;  %s925_s22 = smov 24   ;;  %vm695_vm6 = vcmask 92160  }
  0xf6   : >> { %582 = vrot.lane.b32.xlu0 %v912_v58, %s923_s17  ;;  %849 = vmatpush3.msk.msra.mxu0 %vm587_vm3, %v982_v8  ;;  %s662_s21 = scalar_lea.vmem [#allocation2], %s825_s20  ;;  %s694_s23 = scalar_lea.vmem %s993_s12, %s825_s20 }
  0xf7   : >> { %850 = vmatprep.subr.mxu0 %v921_v59  ;;  %s573_s16 = sadd.s32 1, %s916_s16  }
  0xf8   : >> { %851 = vmatpush3.msra.mxu0 %v980_v7  ;;  %p570_p4 = scmp.ge.s32.totalorder %s573_s16, 2  }
  0xfa   : >> { %v663_v0 = vld [vmem:[%s662_s21] sm:$0x7] }
 0x168   : >> { %v583_v60 = vpop.permute.xlu0 %582 }
 0x169   : >> { %853 = vmatmul.mubr.msk.f32.vlgmr.msra.gmra.mxu0 %vm584_vm5, %v583_v60 }
 0x229   : >> { %v657_v61 = vpop.f32.mrf.mxu0 }
 0x22a   : >> { %v658_v62 = vadd.f32 %v984_v9, %v657_v61 }
 0x22b   : >> { %v854_v63 = vpop.f32.mrf.mxu0 }
 0x22c   : >> { %672 = vrot.lane.b32.xlu0 %v658_v62, %s924_s19  ;;  %v664_v1 = vadd.f32 %v663_v0, %v658_v62 }
 0x22e   : >> { %v826_v2 = vmul.f32 -1.442695, %v664_v1 }
 0x230   : >> { %888 = vpow2.f32 %v826_v2 }
 0x23d   : >> { %v889_v3 = vpop.eup %888 }
 0x23e   : >> { %v668_v4 = vadd.f32 1.0, %v889_v3 }
 0x240   : >> { %890 = vrcp.f32 %v668_v4 }
 0x24d   : >> { %v891_v5 = vpop.eup %890 }
 0x24e   : >> { %v682_v14 = vsub.f32 1.0, %v891_v5  ;;  %v688_v16 = vmul.f32 %v912_v58, %v891_v5 }
 0x29e   : >> { %v673_v6 = vpop.permute.xlu0 %672 }
 0x29f   : >> { %v675_v10 = vmul.f32 %v891_v5, %v673_v6 }
 0x2a1   : >> { %677 = vrot.lane.b32.xlu1 %v675_v10, %s925_s22 }
 0x313   : >> { %v678_v11 = vpop.permute.xlu1 %677 }
 0x314   : >> { %v680_v12 = vadd.f32 %v678_v11, %v663_v0 }
 0x316   : >> { %892 = vtanh.f32 %v680_v12 }
 0x323   : >> { %v893_v13 = vpop.eup %892 }
 0x324   : >> { %684 = vrot.lane.b32.xlu1 %v893_v13, %s923_s17 }
 0x396   : >> { %v685_v15 = vpop.permute.xlu1 %684 }
 0x397   : >> { %v687_v17 = vmul.f32 %v685_v15, %v682_v14 }
 0x399   : >> { %v689_v58 = vadd.f32 %v688_v16, %v687_v17  }
 0x39b   : >> { %691 = vrot.lane.b32.xlu0 %v689_v58, %s923_s17 }
 0x40a   : > { %572 = sbr.rel (!%p570_p4) target bundleno = 244 (0xf4), region = 91 }
 0x40d   : >> { %v692_v18 = vpop.permute.xlu0 %691 }
 0x40e   : >> { %696 = vst.msk [vmem:[%s694_s23] sm:$0x7] %vm695_vm6, %v692_v18 }
 0x40f PF: > { %s15_s18 = sadd.s32 1, %s908_s18  }
 0x410   : > { %p12_p5 = scmp.ge.s32.totalorder %s15_s18, 4  }
 0x412   :  { %14 = sbr.rel (!%p12_p5) target bundleno = 1 (0x1), region = 102 }

// kernel: _lambda_.9
= control target key start
LH: loop header
LB: loop body
LE: loop exit
PB: predicated region body
PF: predicated region fallthrough
CT: control target
= control target key end

     0   :  { %s815_s18 = smov 0   ;;  %s889_s0 = inlined_call_operand.vmem [shape: f32[2,6,8,8], index: 0, kind: input, shape index: {}]   ;;  %s890_s1 = inlined_call_operand.vmem [shape: f32[2,8,36], index: 1, kind: input, shape index: {}]   ;;  %s891_s2 = inlined_call_operand.vmem [shape: f32[2,1,36], index: 2, kind: input, shape index: {}]   ;;  %s892_s3 = inlined_call_operand.vmem [shape: f32[2,12,36], index: 3, kind: input, shape index: {}]   ;;  %s893_s4 = inlined_call_operand.vmem [shape: f32[2,1,36], index: 4, kind: input, shape index: {}]   ;;  %s894_s5 = inlined_call_operand.vmem [shape: f32[2,6,8,12], index: 5, kind: output, shape index: {}]  }
   0x1 LB: > { %s665_s19 = sadd.s32 4294967295, %s770_s18   ;;  %p669_p0 = scmp.ge.s32.totalorder %s770_s18, 1  ;;  %s770_s18 = sphi %s815_s18, %s15_s18  }
   0x2   : > { %p222_p1 = scmp.lt.s32.totalorder %s770_s18, 3 }
   0x4   : > { %p223_p2 = pnand %p669_p0, %p222_p1 }
   0x5   : > { %p265_p3 = scmp.lt.s32.totalorder (!%p223_p2), %s665_s19, 1  ;;  %s868_s16 = smov (!%p223_p2), 0  }
   0x6   : > { %226 = sbr.rel (%p223_p2) target bundleno = 1016 (0x3f8), region = 40 }
   0xb   : > { %s896_s19 = smov (!%p265_p3, %s665_s19), 1  ;;  %vm304_vm0 = vcmask 64512   ;;  %vm418_vm1 = vcmask 293888   ;;  %v772_v23 = vmov 0.0  }
   0xc   : > { %s671_s20 = sshll.u32 %s896_s19, 3  ;;  %s689_s21 = sshll.u32 %s896_s19, 4 }
   0xd   : > { %s273_s24 = scalar_lea.vmem %s890_s1, %s671_s20  ;;  %s281_s27 = scalar_lea.vmem %s892_s3, %s689_s21 }
   0xe   : > { %s284_s30 = scalar_lea.vmem %s893_s4, %s896_s19  ;;  %v296_v0 = vld [vmem:[%s273_s24] sm:$0xff]  ;;  %v839_v2 = vld [vmem:[%s281_s27 + $0x8] sm:$0xf]  ;;  %s720_s6 = smul.u32 48, %s896_s19 }
   0xf   : > { %v837_v1 = vld [vmem:[%s281_s27] sm:$0xff]  ;;  %718 = vmatprep.subr.mxu1 %v296_v0  ;;  %700 = vmatprep.subr.mxu0 %v296_v0  ;;  %s276_s15 = scalar_lea.vmem %s891_s2, %s896_s19 }
  0x10   : > { %v842_v3 = vld [vmem:[%s284_s30] ss:$0 sm:$0xff]  ;;  %719 = vmatpush3.msra.mxu1 %v296_v0  ;;  %s269_s9 = scalar_lea.vmem %s889_s0, %s720_s6  ;;  %s850_s12 = scalar_lea.vmem %s894_s5, %s720_s6  ;;  %701 = vmatpush3.msra.mxu0 %v296_v0 }
  0x11   : > { %v292_v4 = vld [vmem:[%s269_s9 + $0x10] sm:$0xff]  ;;  %v293_v5 = vld [vmem:[%s269_s9 + $0x18] sm:$0xff]  ;;  %v290_v6 = vld [vmem:[%s269_s9] sm:$0xff] }
  0x12   : > { %705 = vmatprep.mubr.msk.f32.mxu1 %vm304_vm0, %v292_v4  ;;  %702 = vmatprep.mubr.msk.f32.mxu0 %vm304_vm0, %v290_v6  ;;  %v291_v7 = vld [vmem:[%s269_s9 + $0x8] sm:$0xff]  ;;  %v294_v8 = vld [vmem:[%s269_s9 + $0x20] sm:$0xff] }
  0x13   : > { %706 = vmatmul.mubr.msk.f32.vlgmr.msra.gmra.mxu1 %vm304_vm0, %v293_v5  ;;  %703 = vmatmul.mubr.msk.f32.vlgmr.msra.gmra.mxu0 %vm304_vm0, %v291_v7  ;;  %v295_v9 = vld [vmem:[%s269_s9 + $0x28] sm:$0xff]  ;;  %v675_v10 = vld [vmem:[%s276_s15] ss:$0 sm:$0xff] }
  0x14   : > { %708 = vmatprep.mubr.msk.f32.mxu1 %vm304_vm0, %v294_v8 }
  0x17   : > { %709 = vmatmul.mubr.msk.f32.gmra.mxu1 %vm304_vm0, %v295_v9 }
  0xd3   : > { %v707_v11 = vpop.f32.mrf.mxu1  ;;  %v704_v12 = vpop.f32.mrf.mxu0 }
  0xd4   : > { %v405_v13 = vadd.f32 %v707_v11, %v675_v10  ;;  %v395_v14 = vadd.f32 %v704_v12, %v675_v10 }
  0xd5   : > { %v399_v15 = vpop.f32.mrf.mxu1  ;;  %v389_v16 = vpop.f32.mrf.mxu0 }
  0xd6   : > { %422 = vst.msk [vmem:[#allocation2 + $0x18] sm:$0xff] %vm418_vm1, %v405_v13  ;;  %420 = vst.msk [vmem:[#allocation2 + $0x8] sm:$0xff] %vm418_vm1, %v395_v14  ;;  %v400_v17 = vadd.f32 %v675_v10, %v399_v15  ;;  %v390_v18 = vadd.f32 %v675_v10, %v389_v16 }
  0xd7   : > { %v710_v19 = vpop.f32.mrf.mxu1 }
  0xd8   : > { %421 = vst.msk [vmem:[#allocation2 + $0x10] sm:$0xff] %vm418_vm1, %v400_v17  ;;  %419 = vst.msk [vmem:[#allocation2] sm:$0xff] %vm418_vm1, %v390_v18  ;;  %v415_v20 = vadd.f32 %v710_v19, %v675_v10 }
  0xd9   : > { %v409_v21 = vpop.f32.mrf.mxu1 }
  0xda   : > { %424 = vst.msk [vmem:[#allocation2 + $0x28] sm:$0xff] %vm418_vm1, %v415_v20  ;;  %v410_v22 = vadd.f32 %v675_v10, %v409_v21 }
  0xdc   : > { %423 = vst.msk [vmem:[#allocation2 + $0x20] sm:$0xff] %vm418_vm1, %v410_v22 }
  0xdd LB: >> { %vm447_vm2 = vcmask 1043456   ;;  %v780_v24 = vmov 0.0   ;;  %vm781_vm3 = vmmov 0   ;;  %s782_s17 = smov 116   ;;  %vm444_vm4 = vcmask 97280   ;;  %s783_s19 = smov 104   ;;  %s778_s16 = sphi %s868_s16, %s433_s16   ;;  %v774_v23 = vphi %v772_v23, %v549_v23  }
  0xde   : >> { %711 = vmatprep.subr.mxu0 %v780_v24  ;;  %715 = vmatprep.mubr.msk.f32.mxu0 %vm781_vm3, %v780_v24  ;;  %s685_s20 = sshll.u32 %s778_s16, 3  ;;  %s784_s22 = smov 24  }
  0xdf   : >> { %442 = vrot.lane.b32.xlu0 %v774_v23, %s782_s17  ;;  %712 = vmatpush3.msk.msra.mxu0 %vm447_vm2, %v839_v2  ;;  %s522_s21 = scalar_lea.vmem [#allocation2], %s685_s20  ;;  %s554_s23 = scalar_lea.vmem %s850_s12, %s685_s20 }
  0xe0   : >> { %713 = vmatprep.subr.mxu0 %v780_v24  ;;  %s433_s16 = sadd.s32 1, %s778_s16  }
  0xe1   : >> { %714 = vmatpush3.msra.mxu0 %v837_v1  ;;  %p430_p4 = scmp.ge.s32.totalorder %s433_s16, 6  }
  0xe3   : >> { %v523_v29 = vld [vmem:[%s522_s21] sm:$0xff] }
 0x151   : >> { %v443_v25 = vpop.permute.xlu0 %442 }
 0x152   : >> { %716 = vmatmul.mubr.msk.f32.vlgmr.msra.gmra.mxu0 %vm444_vm4, %v443_v25 }
 0x212   : >> { %v517_v26 = vpop.f32.mrf.mxu0 }
 0x213   : >> { %v518_v27 = vadd.f32 %v842_v3, %v517_v26 }
 0x214   : >> { %v717_v28 = vpop.f32.mrf.mxu0 }
 0x215   : >> { %532 = vrot.lane.b32.xlu0 %v518_v27, %s783_s19  ;;  %v524_v30 = vadd.f32 %v523_v29, %v518_v27 }
 0x217   : >> { %v686_v31 = vmul.f32 -1.442695, %v524_v30 }
 0x219   : >> { %750 = vpow2.f32 %v686_v31 }
 0x226   : >> { %v751_v32 = vpop.eup %750 }
 0x227   : >> { %v528_v33 = vadd.f32 1.0, %v751_v32 }
 0x229   : >> { %752 = vrcp.f32 %v528_v33 }
 0x236   : >> { %v753_v34 = vpop.eup %752 }
 0x237   : >> { %v542_v40 = vsub.f32 1.0, %v753_v34  ;;  %v548_v42 = vmul.f32 %v774_v23, %v753_v34 }
 0x287   : >> { %v533_v35 = vpop.permute.xlu0 %532 }
 0x288   : >> { %v535_v36 = vmul.f32 %v753_v34, %v533_v35 }
 0x28a   : >> { %537 = vrot.lane.b32.xlu1 %v535_v36, %s784_s22 }
 0x2fc   : >> { %v538_v37 = vpop.permute.xlu1 %537 }
 0x2fd   : >> { %v540_v38 = vadd.f32 %v538_v37, %v523_v29 }
 0x2ff   : >> { %754 = vtanh.f32 %v540_v38 }
 0x30c   : >> { %v755_v39 = vpop.eup %754 }
 0x30d   : >> { %544 = vrot.lane.b32.xlu1 %v755_v39, %s782_s17 }
 0x37f   : >> { %v545_v41 = vpop.permute.xlu1 %544 }
 0x380   : >> { %v547_v43 = vmul.f32 %v545_v41, %v542_v40 }
 0x382   : >> { %v549_v23 = vadd.f32 %v548_v42, %v547_v43  }
 0x384   : >> { %551 = vrot.lane.b32.xlu0 %v549_v23, %s782_s17 }
 0x3f3   : > { %432 = sbr.rel (!%p430_p4) target bundleno = 221 (0xdd), region = 91 }
 0x3f6   : >> { %v552_v44 = vpop.permute.xlu0 %551 }
 0x3f7   : >> { %555 = vst.msk [vmem:[%s554_s23] sm:$0xff] %vm444_vm4, %v552_v44 }
 0x3f8 PF: > { %s15_s18 = sadd.s32 1, %s770_s18  }
 0x3f9   : > { %p12_p5 = scmp.ge.s32.totalorder %s15_s18, 4  }
 0x3fb   :  { %14 = sbr.rel (!%p12_p5) target bundleno = 1 (0x1), region = 102 }

// kernel: _lambda_.7
= control target key start
LH: loop header
LB: loop body
LE: loop exit
PB: predicated region body
PF: predicated region fallthrough
CT: control target
= control target key end

     0   :  { %vm26_vm0 = vcmask 195584   ;;  %vm114_vm1 = vcmask 123904   ;;  %vm112_vm2 = vcmask 130048   ;;  %s189_s1 = inlined_call_operand.vmem [shape: f32[24,16], index: 1, kind: input, shape index: {}]   ;;  %s190_s0 = inlined_call_operand.vmem [shape: f32[10,24], index: 0, kind: input, shape index: {}]   ;;  %s191_s2 = inlined_call_operand.vmem [shape: f32[1,16], index: 2, kind: input, shape index: {}]   ;;  %s192_s3 = inlined_call_operand.vmem [shape: f32[10,16], index: 3, kind: output, shape index: {}]  }
   0x1   :  { %v18_v0 = vld [vmem:[%s189_s1 + $0x10] sm:$0xff]  ;;  %v17_v1 = vld [vmem:[%s189_s1 + $0x8] sm:$0xff]  ;;  %v14_v2 = vld [vmem:[%s190_s0] sm:$0xff] }
   0x2   :  { %128 = vmatprep.subr.mxu0 %v18_v0  ;;  %v16_v3 = vld [vmem:[%s189_s1] sm:$0xff]  ;;  %134 = vmatprep.mubr.msk.f32.mxu0 %vm26_vm0, %v14_v2  ;;  %v15_v4 = vld [vmem:[%s190_s0 + $0x8] sm:$0x3] }
   0x3   :  { %129 = vmatpush3.msra.mxu0 %v18_v0  ;;  %v120_v5 = vld [vmem:[%s191_s2] ss:$0 sm:$0xff] }
   0x4   :  { %130 = vmatprep.subr.mxu0 %v17_v1 }
   0x5   :  { %131 = vmatpush3.msra.mxu0 %v17_v1 }
   0x6   :  { %132 = vmatprep.subr.mxu0 %v16_v3 }
   0x7   :  { %133 = vmatpush3.msra.mxu0 %v16_v3 }
   0x8   :  { %135 = vmatmul.mubr.msk.f32.vlgmr.msra.gmra.mxu0 %vm26_vm0, %v15_v4 }
  0xc8   :  { %v136_v6 = vpop.f32.mrf.mxu0 }
  0xc9   :  { %v105_v7 = vadd.f32 %v136_v6, %v120_v5 }
  0xca   :  { %v99_v8 = vpop.f32.mrf.mxu0 }
  0xcb   :  { %137 = vtanh.f32 %v105_v7  ;;  %v100_v9 = vadd.f32 %v120_v5, %v99_v8 }
  0xcd   :  { %139 = vtanh.f32 %v100_v9 }
  0xd8   :  { %v138_v10 = vpop.eup %137 }
  0xd9   :  { %141 = vtanh.f32 %v138_v10 }
  0xda   :  { %v140_v11 = vpop.eup %139 }
  0xdb   :  { %143 = vtanh.f32 %v140_v11 }
  0xe6   :  { %v142_v12 = vpop.eup %141 }
  0xe7   :  { %115 = vst.msk [vmem:[%s192_s3 + $0x8] sm:$0x3] %vm114_vm1, %v142_v12 }
  0xe8   :  { %v144_v13 = vpop.eup %143 }
  0xe9   :  { %113 = vst.msk [vmem:[%s192_s3] sm:$0xff] %vm112_vm2, %v144_v13 }

// kernel: _lambda_.8
= control target key start
LH: loop header
LB: loop body
LE: loop exit
PB: predicated region body
PF: predicated region fallthrough
CT: control target
= control target key end

     0   :  { %vm25_vm0 = vcmask 64512   ;;  %s606_s28 = smov 4   ;;  %vm161_vm1 = vcmask 1046528   ;;  %s608_s6 = smov 124   ;;  %vm212_vm2 = vcmask 1045504   ;;  %vm266_vm3 = vcmask 1044480   ;;  %s828_s1 = inlined_call_operand.vmem [shape: f32[8,84], index: 1, kind: input, shape index: {}]   ;;  %s829_s0 = inlined_call_operand.vmem [shape: f32[2,16,8], index: 0, kind: input, shape index: {}]   ;;  %s830_s2 = inlined_call_operand.vmem [shape: f32[1,24], index: 2, kind: input, shape index: {}]   ;;  %s831_s3 = inlined_call_operand.vmem [shape: f32[24,16], index: 3, kind: input, shape index: {}]   ;;  %s832_s4 = inlined_call_operand.vmem [shape: f32[1,16], index: 4, kind: input, shape index: {}]   ;;  %s833_s5 = inlined_call_operand.vmem [shape: f32[2,16], index: 5, kind: output, shape index: {}]  }
   0x1   :  { %v24_v0 = vld [vmem:[%s828_s1] sm:$0xff]  ;;  %v21_v2 = vld [vmem:[%s829_s0 + $0x8] sm:$0xff]  ;;  %v22_v3 = vld [vmem:[%s829_s0 + $0x10] sm:$0xff]  ;;  %s605_s1 = smov 12   ;;  %s610_s7 = smov 112   ;;  %vm320_vm4 = vcmask 1043456  }
   0x2   :  { %v20_v1 = vld [vmem:[%s829_s0] sm:$0xff]  ;;  %575 = vmatprep.subr.mxu0 %v24_v0  ;;  %v23_v5 = vld [vmem:[%s829_s0 + $0x18] sm:$0xff]  ;;  %s609_s0 = smov 116   ;;  %vm374_vm5 = vcmask 1042432   ;;  %s611_s8 = smov 108   ;;  %vm194_vm6 = vcmask 63520  }
   0x3   :  { %577 = vmatprep.mubr.msk.f32.mxu0 %vm25_vm0, %v20_v1  ;;  %v664_v4 = vld [vmem:[%s830_s2] ss:$0 sm:$0xff]  ;;  %576 = vmatpush3.msra.mxu0 %v24_v0  ;;  %s607_s2 = smov 120   ;;  %s612_s9 = smov 24   ;;  %vm192_vm7 = vcmask 64544   ;;  %vm246_vm8 = vcmask 130144  }
   0x4   :  { %289 = vrot.lane.b32.xlu1 %v664_v4, %s605_s1  ;;  %578 = vmatmul.mubr.msk.f32.vlgmr.msra.gmra.mxu0 %vm25_vm0, %v21_v2  ;;  %s613_s10 = smov 40   ;;  %vm248_vm9 = vcmask 128096   ;;  %vm302_vm10 = vcmask 225472   ;;  %vm300_vm11 = vcmask 228544   ;;  %vm354_vm12 = vcmask 359744   ;;  %s616_s17 = smov 104  }
   0x5   :  { %235 = vrot.lane.b32.xlu0 %v664_v4, %s606_s28  ;;  %580 = vmatprep.mubr.msk.f32.mxu0 %vm25_vm0, %v22_v3  ;;  %vm356_vm13 = vcmask 355648   ;;  %vm408_vm14 = vcmask 523744   ;;  %vm410_vm15 = vcmask 518624   ;;  %s617_s18 = smov 88  }
   0x8   :  { %581 = vmatmul.mubr.msk.f32.gmra.mxu0 %vm25_vm0, %v23_v5 }
  0x76   :  { %v730_v40 = vpop.permute.xlu1 %289 }
  0x77   :  { %v732_v41 = vpop.permute.xlu0 %235 }
  0xc4   :  { %v674_v6 = vpop.f32.mrf.mxu0 }
  0xc5   :  { %v214_v7 = vrot.slane %v674_v6, 2  ;;  %v163_v8 = vrot.slane %v674_v6, 1  ;;  %v268_v11 = vrot.slane %v674_v6, 3  ;;  %v322_v14 = vrot.slane %v674_v6, 4 }
  0xc6   :  { %v678_v9 = vpop.f32.mrf.mxu0  ;;  %v376_v24 = vrot.slane %v674_v6, 5 }
  0xc7   :  { %221 = vrot.lane.b32.xlu1 %v214_v7, %s607_s2  ;;  %170 = vrot.lane.b32.xlu0 %v163_v8, %s608_s6  ;;  %v162_v10 = vrot.slane %v678_v9, 1  ;;  %v213_v13 = vrot.slane %v678_v9, 2  ;;  %v267_v17 = vrot.slane %v678_v9, 3  ;;  %v321_v20 = vrot.slane %v678_v9, 4 }
  0xc8   :  { %v689_v15 = vpop.f32.mrf.mxu0  ;;  %v375_v23 = vrot.slane %v678_v9, 5 }
  0xc9   :  { %v164_v12 = vsel %vm161_vm1, %v162_v10, %v163_v8  ;;  %v215_v16 = vsel %vm212_vm2, %v213_v13, %v214_v7  ;;  %v166_v18 = vrot.slane %v689_v15, 1  ;;  %v269_v19 = vsel %vm266_vm3, %v267_v17, %v268_v11 }
  0xca   :  { %v217_v21 = vrot.slane %v689_v15, 2  ;;  %v323_v22 = vsel %vm320_vm4, %v321_v20, %v322_v14  ;;  %v706_v25 = vpop.f32.mrf.mxu0  ;;  %v271_v26 = vrot.slane %v689_v15, 3  ;;  %v377_v27 = vsel %vm374_vm5, %v375_v23, %v376_v24 }
  0xcb   :  { %275 = vrot.lane.b32.xlu1 %v268_v11, %s609_s0  ;;  %168 = vrot.lane.b32.xlu0 %v164_v12, %s608_s6  ;;  %v216_v28 = vrot.slane %v706_v25, 2  ;;  %v325_v29 = vrot.slane %v689_v15, 4  ;;  %v270_v31 = vrot.slane %v706_v25, 3  ;;  %v165_v32 = vrot.slane %v706_v25, 1 }
  0xcc   :  { %v324_v35 = vrot.slane %v706_v25, 4  ;;  %v378_v37 = vrot.slane %v706_v25, 5  ;;  %v379_v38 = vrot.slane %v689_v15, 5 }
  0xcd   :  { %v218_v30 = vsel %vm212_vm2, %v216_v28, %v217_v21  ;;  %v272_v33 = vsel %vm266_vm3, %v270_v31, %v271_v26  ;;  %v167_v34 = vsel %vm161_vm1, %v165_v32, %v166_v18  ;;  %vm430_vm1 = vcmask 1041409  }
  0xce   :  { %v326_v36 = vsel %vm320_vm4, %v324_v35, %v325_v29  ;;  %v380_v39 = vsel %vm374_vm5, %v378_v37, %v379_v38  ;;  %vm615_vm2 = vmmov 0   ;;  %vm138_vm3 = vcmask 31744  }
  0xcf   :  { %329 = vrot.lane.b32.xlu1 %v322_v14, %s610_s7  ;;  %219 = vrot.lane.b32.xlu0 %v215_v16, %s607_s2  ;;  %vm463_vm4 = vcmask 97280   ;;  %vm465_vm5 = vcmask 130048  }
  0xd3   :  { %273 = vrot.lane.b32.xlu0 %v269_v19, %s609_s0  ;;  %174 = vrot.lane.b32.xlu1 %v166_v18, %s608_s6 }
  0xd7   :  { %327 = vrot.lane.b32.xlu0 %v323_v22, %s610_s7  ;;  %225 = vrot.lane.b32.xlu1 %v217_v21, %s607_s2 }
  0xdb   :  { %381 = vrot.lane.b32.xlu0 %v377_v27, %s611_s8  ;;  %279 = vrot.lane.b32.xlu1 %v271_v26, %s609_s0 }
  0xdf   :  { %333 = vrot.lane.b32.xlu1 %v325_v29, %s610_s7  ;;  %223 = vrot.lane.b32.xlu0 %v218_v30, %s607_s2 }
  0xe3   :  { %277 = vrot.lane.b32.xlu0 %v272_v33, %s609_s0  ;;  %172 = vrot.lane.b32.xlu1 %v167_v34, %s608_s6 }
  0xe7   :  { %331 = vrot.lane.b32.xlu0 %v326_v36, %s610_s7  ;;  %383 = vrot.lane.b32.xlu1 %v376_v24, %s611_s8 }
  0xeb   :  { %385 = vrot.lane.b32.xlu0 %v380_v39, %s611_s8  ;;  %387 = vrot.lane.b32.xlu1 %v379_v38, %s611_s8 }
  0xef   :  { %343 = vrot.lane.b32.xlu0 %v664_v4, %s612_s9  ;;  %397 = vrot.lane.b32.xlu1 %v664_v4, %s613_s10 }
 0x139   :  { %v222_v42 = vpop.permute.xlu1 %221  ;;  %v171_v43 = vpop.permute.xlu0 %170 }
 0x13a   :  { %v181_v44 = vadd.f32 %v674_v6, %v171_v43 }
 0x13c   :  { %v185_v45 = vadd.f32 %v664_v4, %v181_v44  ;;  %v232_v46 = vadd.f32 %v222_v42, %v181_v44 }
 0x13d   :  { %v276_v47 = vpop.permute.xlu1 %275  ;;  %v169_v48 = vpop.permute.xlu0 %168 }
 0x13e   :  { %v180_v49 = vadd.f32 %v169_v48, %v678_v9  ;;  %v189_v50 = vmax.f32 %v185_v45, 0.0  ;;  %v737_v51 = vadd.f32 %v276_v47, %v232_v46  ;;  %v239_v55 = vadd.f32 %v732_v41, %v232_v46 }
 0x140   :  { %v184_v52 = vadd.f32 %v664_v4, %v180_v49  ;;  %v195_v58 = vsel %vm194_vm6, %v189_v50, -inf  ;;  %v293_v59 = vadd.f32 %v730_v40, %v737_v51  ;;  %v243_v1 = vmax.f32 %v239_v55, 0.0 }
 0x141   :  { %v740_v53 = vpop.permute.xlu1 %329  ;;  %v220_v54 = vpop.permute.xlu0 %219 }
 0x142   :  { %v188_v56 = vmax.f32 %v184_v52, 0.0  ;;  %v231_v57 = vadd.f32 %v220_v54, %v180_v49  ;;  %v297_v5 = vmax.f32 %v293_v59, 0.0  ;;  %v249_v13 = vsel %vm248_vm9, %v243_v1, -inf }
 0x144   :  { %v193_v60 = vsel %vm192_vm7, %v188_v56, -inf  ;;  %v238_v62 = vadd.f32 %v732_v41, %v231_v57  ;;  %v303_v17 = vsel %vm302_vm10, %v297_v5, -inf }
 0x145   :  { %v196_v61 = vmax.f32 %v193_v60, %v195_v58  ;;  %v274_v63 = vpop.permute.xlu0 %273  ;;  %v175_v0 = vpop.permute.xlu1 %174 }
 0x146   :  { %v285_v2 = vadd.f32 %v274_v63, %v231_v57  ;;  %v242_v3 = vmax.f32 %v238_v62, 0.0  ;;  %v183_v26 = vadd.f32 %v689_v15, %v175_v0 }
 0x147   :  { %v197_v12 = vrot.slane %v196_v61, 4 }
 0x148   :  { %v292_v7 = vadd.f32 %v730_v40, %v285_v2  ;;  %v247_v8 = vsel %vm246_vm8, %v242_v3, -inf  ;;  %v187_v33 = vadd.f32 %v664_v4, %v183_v26 }
 0x149   :  { %v328_v10 = vpop.permute.xlu0 %327  ;;  %v226_v11 = vpop.permute.xlu1 %225  ;;  %v250_v16 = vmax.f32 %v247_v8, %v249_v13  ;;  %v198_v22 = vmax.f32 %v196_v61, %v197_v12 }
 0x14a   :  { %v296_v14 = vmax.f32 %v292_v7, 0.0  ;;  %v234_v27 = vadd.f32 %v226_v11, %v183_v26  ;;  %v191_v44 = vmax.f32 %v187_v33, 0.0  ;;  %v339_v48 = vadd.f32 %v328_v10, %v285_v2 }
 0x14b   :  { %v251_v23 = vrot.slane %v250_v16, 4  ;;  %v199_v30 = vrot.slane %v198_v22, 2  ;;  %v340_v2 = vadd.f32 %v740_v53, %v737_v51 }
 0x14c   :  { %v301_v18 = vsel %vm300_vm11, %v296_v14, -inf  ;;  %v241_v35 = vadd.f32 %v732_v41, %v234_v27  ;;  %v204_v58 = vsel %vm194_vm6, %v191_v44, -inf  ;;  %vm467_vm6 = vcmask 162816  }
 0x14d   :  { %v304_v19 = vmax.f32 %v301_v18, %v303_v17  ;;  %v382_v20 = vpop.permute.xlu0 %381  ;;  %v280_v21 = vpop.permute.xlu1 %279  ;;  %v252_v31 = vmax.f32 %v250_v16, %v251_v23  ;;  %v200_v38 = vmax.f32 %v198_v22, %v199_v30 }
 0x14e   :  { %v288_v34 = vadd.f32 %v280_v21, %v234_v27  ;;  %v245_v49 = vmax.f32 %v241_v35, 0.0  ;;  %v393_v3 = vadd.f32 %v382_v20, %v339_v48 }
 0x14f   :  { %v305_v24 = vrot.slane %v304_v19, 4  ;;  %v253_v42 = vrot.slane %v252_v31, 2  ;;  %v201_v54 = vrot.slane %v200_v38, 1 }
 0x150   :  { %v295_v45 = vadd.f32 %v730_v40, %v288_v34 }
 0x151   :  { %v334_v28 = vpop.permute.xlu1 %333  ;;  %v224_v29 = vpop.permute.xlu0 %223  ;;  %v306_v32 = vmax.f32 %v304_v19, %v305_v24  ;;  %v761_v60 = vmax.f32 %v252_v31, %v253_v42  ;;  %v771_v13 = vmax.f32 %v200_v38, %v201_v54 }
 0x152   :  { %v299_v59 = vmax.f32 %v295_v45, 0.0  ;;  %v342_v10 = vadd.f32 %v334_v28, %v288_v34 }
 0x153   :  { %v307_v43 = vrot.slane %v306_v32, 2  ;;  %v255_v51 = vrot.slane %v761_v60, 1 }
 0x154   :  { %v312_v14 = vsel %vm302_vm10, %v299_v59, -inf }
 0x155   :  { %v278_v36 = vpop.permute.xlu0 %277  ;;  %v173_v37 = vpop.permute.xlu1 %172  ;;  %v763_v61 = vmax.f32 %v306_v32, %v307_v43 }
 0x156   :  { %v182_v39 = vadd.f32 %v173_v37, %v706_v25 }
 0x157   :  { %v309_v19 = vrot.slane %v763_v61, 1 }
 0x158   :  { %v186_v46 = vadd.f32 %v664_v4, %v182_v39  ;;  %v233_v47 = vadd.f32 %v224_v29, %v182_v39 }
 0x159   :  { %v332_v50 = vpop.permute.xlu0 %331  ;;  %v384_v52 = vpop.permute.xlu1 %383 }
 0x15a   :  { %v190_v55 = vmax.f32 %v186_v46, 0.0  ;;  %v240_v56 = vadd.f32 %v732_v41, %v233_v47  ;;  %v287_v57 = vadd.f32 %v278_v36, %v233_v47  ;;  %v258_v41 = vsel %vm248_vm9, %v245_v49, -inf }
 0x15b   :  { %v394_v17 = vadd.f32 %v384_v52, %v340_v2 }
 0x15c   :  { %v203_v62 = vsel %vm192_vm7, %v190_v55, -inf  ;;  %v244_v63 = vmax.f32 %v240_v56, 0.0  ;;  %v294_v0 = vadd.f32 %v730_v40, %v287_v57  ;;  %v341_v1 = vadd.f32 %v332_v50, %v287_v57 }
 0x15d   :  { %v205_v5 = vmax.f32 %v203_v62, %v204_v58  ;;  %v386_v7 = vpop.permute.xlu0 %385  ;;  %v388_v8 = vpop.permute.xlu1 %387  ;;  %vm479_vm7 = vcmask 195584  }
 0x15e   :  { %v257_v11 = vsel %vm246_vm8, %v244_v63, -inf  ;;  %v298_v12 = vmax.f32 %v294_v0, 0.0  ;;  %v395_v18 = vadd.f32 %v386_v7, %v341_v1  ;;  %v396_v23 = vadd.f32 %v388_v8, %v342_v10 }
 0x15f   :  { %v206_v16 = vrot.slane %v205_v5, 4  ;;  %v259_v40 = vmax.f32 %v257_v11, %v258_v41  ;;  %vm553_vm8 = vcmask 123904  }
 0x160   :  { %v311_v53 = vsel %vm300_vm11, %v298_v12, -inf }
 0x161   :  { %v207_v20 = vmax.f32 %v205_v5, %v206_v16  ;;  %v260_v21 = vrot.slane %v259_v40, 4  ;;  %v313_v22 = vmax.f32 %v311_v53, %v312_v14  ;;  %v344_v24 = vpop.permute.xlu0 %343  ;;  %v398_v26 = vpop.permute.xlu1 %397  ;;  %v256_v53 = vmax.f32 %v761_v60, %v255_v51 }
 0x162   :  { %v346_v27 = vadd.f32 %v344_v24, %v339_v48  ;;  %v347_v28 = vadd.f32 %v344_v24, %v340_v2  ;;  %v348_v29 = vadd.f32 %v344_v24, %v341_v1  ;;  %v349_v30 = vadd.f32 %v344_v24, %v342_v10 }
 0x163   :  { %v208_v31 = vrot.slane %v207_v20, 2  ;;  %v261_v32 = vmax.f32 %v259_v40, %v260_v21  ;;  %v314_v33 = vrot.slane %v313_v22, 4  ;;  %v400_v34 = vadd.f32 %v398_v26, %v393_v3 }
 0x164   :  { %v350_v35 = vmax.f32 %v346_v27, 0.0  ;;  %v351_v36 = vmax.f32 %v347_v28, 0.0  ;;  %v352_v37 = vmax.f32 %v348_v29, 0.0  ;;  %v353_v38 = vmax.f32 %v349_v30, 0.0  ;;  %v471_v29 = vld [vmem:[%s831_s3 + $0x10] sm:$0xff] }
 0x165   :  { %v209_v39 = vmax.f32 %v207_v20, %v208_v31  ;;  %v315_v42 = vmax.f32 %v313_v22, %v314_v33  ;;  %v401_v43 = vadd.f32 %v398_v26, %v394_v17  ;;  %v402_v44 = vadd.f32 %v398_v26, %v395_v18 }
 0x166   :  { %v355_v45 = vsel %vm354_vm12, %v350_v35, -inf  ;;  %v357_v46 = vsel %vm356_vm13, %v351_v36, -inf  ;;  %v365_v47 = vsel %vm354_vm12, %v352_v37, -inf  ;;  %v366_v48 = vsel %vm356_vm13, %v353_v38, -inf  ;;  %v469_v37 = vld [vmem:[%s831_s3] sm:$0xff] }
 0x167   :  { %v210_v49 = vrot.slane %v209_v39, 1  ;;  %v358_v50 = vmax.f32 %v355_v45, %v357_v46  ;;  %v367_v52 = vmax.f32 %v365_v47, %v366_v48  ;;  %v403_v54 = vadd.f32 %v398_v26, %v396_v23 }
 0x168   :  { %v404_v55 = vmax.f32 %v400_v34, 0.0  ;;  %v405_v56 = vmax.f32 %v401_v43, 0.0  ;;  %v406_v57 = vmax.f32 %v402_v44, 0.0  ;;  %v262_v58 = vrot.slane %v261_v32, 2 }
 0x169   :  { %v359_v59 = vrot.slane %v358_v50, 4  ;;  %v368_v62 = vrot.slane %v367_v52, 4  ;;  %v407_v63 = vmax.f32 %v403_v54, 0.0  ;;  %v316_v0 = vrot.slane %v315_v42, 2 }
 0x16a   :  { %v409_v1 = vsel %vm408_vm14, %v404_v55, -inf  ;;  %v411_v2 = vsel %vm410_vm15, %v405_v56, -inf  ;;  %v419_v41 = vsel %vm408_vm14, %v406_v57, -inf  ;;  %v263_v3 = vmax.f32 %v261_v32, %v262_v58 }
 0x16b   :  { %v412_v5 = vmax.f32 %v409_v1, %v411_v2  ;;  %v420_v7 = vsel %vm410_vm15, %v407_v63, -inf  ;;  %v317_v8 = vmax.f32 %v315_v42, %v316_v0  ;;  %v360_v10 = vmax.f32 %v358_v50, %v359_v59 }
 0x16c   :  { %v421_v11 = vmax.f32 %v419_v41, %v420_v7  ;;  %v264_v12 = vrot.slane %v263_v3, 1  ;;  %v369_v14 = vmax.f32 %v367_v52, %v368_v62  ;;  %v211_v16 = vmax.f32 %v209_v39, %v210_v49 }
 0x16d   :  { %v413_v40 = vrot.slane %v412_v5, 4  ;;  %v318_v17 = vrot.slane %v317_v8, 1  ;;  %v361_v18 = vrot.slane %v360_v10, 2  ;;  %v310_v24 = vmax.f32 %v763_v61, %v309_v19  ;;  %v470_v61 = vld [vmem:[%s831_s3 + $0x8] sm:$0xff] }
 0x16e   :  { %v422_v20 = vrot.slane %v421_v11, 4  ;;  %v265_v21 = vmax.f32 %v263_v3, %v264_v12  ;;  %v370_v22 = vrot.slane %v369_v14, 2  ;;  %v788_v23 = vsel %vm430_vm1, %v211_v16, %v771_v13 }
 0x16f   :  { %v319_v26 = vmax.f32 %v317_v8, %v318_v17  ;;  %v362_v27 = vmax.f32 %v360_v10, %v361_v18  ;;  %v414_v28 = vmax.f32 %v412_v5, %v413_v40  ;;  %v614_v33 = vmov 0.0  }
 0x170   :  { %v439_v60 = vsel %vm430_vm1, %v265_v21, %v256_v53  ;;  %v371_v51 = vmax.f32 %v369_v14, %v370_v22  ;;  %v423_v30 = vmax.f32 %v421_v11, %v422_v20  ;;  %583 = vmatprep.subr.mxu1 %v614_v33  ;;  %589 = vmatprep.mubr.msk.f32.mxu1 %vm615_vm2, %v614_v33  ;;  %v564_v22 = vld [vmem:[%s832_s4] ss:$0 sm:$0xff] }
 0x171   :  { %440 = vrot.lane.b32.xlu0 %v439_v60, %s608_s6  ;;  %v445_v31 = vsel %vm430_vm1, %v319_v26, %v310_v24  ;;  %v363_v32 = vrot.slane %v362_v27, 1  ;;  %v415_v13 = vrot.slane %v414_v28, 2  ;;  %584 = vmatpush3.msra.mxu1 %v471_v29  ;;  %v133_v48 = vadd.f32 %v689_v15, %v664_v4 }
 0x172   :  { %446 = vrot.lane.b32.xlu1 %v445_v31, %s609_s0  ;;  %v372_v19 = vrot.slane %v371_v51, 1  ;;  %v424_v34 = vrot.slane %v423_v30, 2  ;;  %585 = vmatprep.subr.mxu1 %v614_v33  ;;  %v132_v49 = vadd.f32 %v664_v4, %v706_v25  ;;  %v130_v50 = vadd.f32 %v664_v4, %v678_v9 }
 0x173   :  { %v364_v35 = vmax.f32 %v362_v27, %v363_v32  ;;  %v416_v36 = vmax.f32 %v414_v28, %v415_v13  ;;  %586 = vmatpush3.msra.mxu1 %v470_v61  ;;  %v131_v52 = vadd.f32 %v674_v6, %v664_v4  ;;  %v137_v54 = vmax.f32 %v133_v48, 0.0 }
 0x174   :  { %v373_v38 = vmax.f32 %v371_v51, %v372_v19  ;;  %v425_v39 = vmax.f32 %v423_v30, %v424_v34  ;;  %587 = vmatprep.subr.mxu1 %v614_v33  ;;  %v136_v55 = vmax.f32 %v132_v49, 0.0  ;;  %v134_v56 = vmax.f32 %v130_v50, 0.0 }
 0x175   :  { %v417_v42 = vrot.slane %v416_v36, 1  ;;  %588 = vmatpush3.msra.mxu1 %v469_v37  ;;  %v135_v57 = vmax.f32 %v131_v52, 0.0  ;;  %v149_v58 = vsel %vm138_vm3, %v137_v54, -inf }
 0x176   :  { %v451_v43 = vsel %vm430_vm1, %v373_v38, %v364_v35  ;;  %v426_v44 = vrot.slane %v425_v39, 1  ;;  %v148_v59 = vsel %vm138_vm3, %v136_v55, -inf  ;;  %v139_v15 = vsel %vm138_vm3, %v134_v56, -inf }
 0x177   :  { %452 = vrot.lane.b32.xlu0 %v451_v43, %s616_s17  ;;  %v418_v45 = vmax.f32 %v416_v36, %v417_v42  ;;  %v150_v62 = vmax.f32 %v148_v59, %v149_v58  ;;  %v140_v25 = vsel %vm138_vm3, %v135_v57, -inf }
 0x178   :  { %v427_v46 = vmax.f32 %v425_v39, %v426_v44  ;;  %v141_v63 = vmax.f32 %v139_v15, %v140_v25 }
 0x179   :  { %v151_v0 = vrot.slane %v150_v62, 4 }
 0x17a   :  { %v457_v47 = vsel %vm430_vm1, %v427_v46, %v418_v45  ;;  %v142_v9 = vrot.slane %v141_v63, 4 }
 0x17b   :  { %458 = vrot.lane.b32.xlu1 %v457_v47, %s617_s18  ;;  %v152_v1 = vmax.f32 %v150_v62, %v151_v0 }
 0x17c   :  { %v143_v2 = vmax.f32 %v141_v63, %v142_v9 }
 0x17d   :  { %v153_v4 = vrot.slane %v152_v1, 2 }
 0x17e   :  { %v144_v6 = vrot.slane %v143_v2, 2 }
 0x17f   :  { %v154_v41 = vmax.f32 %v152_v1, %v153_v4 }
 0x180   :  { %v145_v3 = vmax.f32 %v143_v2, %v144_v6 }
 0x181   :  { %v155_v5 = vrot.slane %v154_v41, 1 }
 0x182   :  { %v146_v7 = vrot.slane %v145_v3, 1 }
 0x183   :  { %v156_v8 = vmax.f32 %v154_v41, %v155_v5 }
 0x184   :  { %v147_v10 = vmax.f32 %v145_v3, %v146_v7 }
 0x186   :  { %v431_v12 = vsel %vm430_vm1, %v156_v8, %v147_v10 }
 0x187   :  { %v461_v14 = vsel %vm138_vm3, %v431_v12, %v788_v23 }
 0x1e3   :  { %v441_v11 = vpop.permute.xlu0 %440 }
 0x1e4   :  { %v462_v16 = vsel %vm25_vm0, %v461_v14, %v441_v11  ;;  %v447_v40 = vpop.permute.xlu1 %446 }
 0x1e5   :  { %v464_v17 = vsel %vm463_vm4, %v462_v16, %v447_v40 }
 0x1e9   :  { %v453_v53 = vpop.permute.xlu0 %452 }
 0x1ea   :  { %v466_v18 = vsel %vm465_vm5, %v464_v17, %v453_v53 }
 0x1ed   :  { %v459_v20 = vpop.permute.xlu1 %458 }
 0x1ee   :  { %v468_v21 = vsel %vm467_vm6, %v466_v18, %v459_v20 }
 0x1ef   :  { %590 = vmatmul.mubr.msk.f32.vlgmr.msra.gmra.mxu1 %vm479_vm7, %v468_v21 }
 0x2af   :  { %v549_v24 = vpop.f32.mrf.mxu1 }
 0x2b0   :  { %v550_v23 = vadd.f32 %v564_v22, %v549_v24 }
 0x2b1   :  { %v591_v26 = vpop.f32.mrf.mxu1 }
 0x2b2   :  { %554 = vst.msk [vmem:[%s833_s5] sm:$0x3] %vm553_vm8, %v550_v23 }

// kernel: _lambda_.13
= control target key start
LH: loop header
LB: loop body
LE: loop exit
PB: predicated region body
PF: predicated region fallthrough
CT: control target
= control target key end

     0   :  { %v735_v0 = vmov 0.0   ;;  %vm736_vm0 = vmmov 0   ;;  %vm48_vm1 = vcmask 130048   ;;  %vm213_vm2 = vcmask 31744   ;;  %s895_s5 = inlined_call_operand.vmem [shape: f32[16,16], index: 5, kind: input, shape index: {}]   ;;  %s896_s1 = inlined_call_operand.vmem [shape: f32[4,16], index: 1, kind: input, shape index: {}]   ;;  %s897_s3 = inlined_call_operand.vmem [shape: f32[16,16], index: 3, kind: input, shape index: {}]   ;;  %s898_s0 = inlined_call_operand.vmem [shape: f32[4,4,16], index: 0, kind: input, shape index: {}]   ;;  %s899_s2 = inlined_call_operand.vmem [shape: f32[16,4], index: 2, kind: input, shape index: {}]   ;;  %s900_s6 = inlined_call_operand.vmem [shape: f32[1,16], index: 6, kind: input, shape index: {}, may-alias: {4,6}]   ;;  %s901_s7 = inlined_call_operand.vmem [shape: f32[16,1], index: 7, kind: input, shape index: {}]   ;;  %s902_s4 = inlined_call_operand.vmem [shape: f32[1,16], index: 4, kind: input, shape index: {}, may-alias: {4,6}]   ;;  %s903_s8 = inlined_call_operand.vmem [shape: f32[4,16], index: 8, kind: output, shape index: {}]  }
   0x1   :  { %694 = vmatprep.subr.mxu1 %v735_v0  ;;  %v130_v1 = vld [vmem:[%s895_s5 + $0x8] sm:$0xff]  ;;  %v129_v2 = vld [vmem:[%s895_s5] sm:$0xff]  ;;  %698 = vmatprep.mubr.msk.f32.mxu1 %vm736_vm0, %v735_v0  ;;  %vm220_vm3 = vcmask 1043456   ;;  %v737_v20 = vmov 0   ;;  %v404_v36 = vlaneseq  ;;  %vm422_vm4 = vcmask 1041409  }
   0x2   :  { %v128_v3 = vld [vmem:[%s896_s1] sm:$0xf]  ;;  %695 = vmatpush3.msra.mxu1 %v130_v1  ;;  %v34_v4 = vld [vmem:[%s897_s3 + $0x8] sm:$0xff]  ;;  %v807_v7 = vld [vmem:[%s898_s0 + $0x4] sm:$0xf]  ;;  %718 = vset.pattern.permute.xlu1 %v737_v20  ;;  %vm424_vm5 = vcmask 1042434  }
   0x3   :  { %v33_v5 = vld [vmem:[%s897_s3] sm:$0xff]  ;;  %696 = vmatprep.subr.mxu1 %v735_v0  ;;  %687 = vmatprep.subr.mxu0 %v34_v4  ;;  %v816_v9 = vld [vmem:[%s898_s0 + $0x8] sm:$0xf]  ;;  %v821_v10 = vld [vmem:[%s898_s0 + $0xc] sm:$0xf]  ;;  %v405_v37 = vand.u32 127, %v404_v36 }
   0x4   :  { %v802_v6 = vld [vmem:[%s898_s0] sm:$0xf]  ;;  %697 = vmatpush3.msra.mxu1 %v129_v2  ;;  %688 = vmatpush3.msra.mxu0 %v34_v4  ;;  %v47_v11 = vcombine.low %v816_v9, %v821_v10  ;;  %v212_v17 = vld [vmem:[%s899_s2 + $0x8] sm:$0xff]  ;;  %v846_v38 = vshrl.u32 %v404_v36, 7  ;;  %vm426_vm6 = vcmask 1043459   ;;  %vm429_vm7 = vcmask 27648  }
   0x5   :  { %v46_v8 = vcombine.low %v802_v6, %v807_v7  ;;  %699 = vmatmul.mubr.msk.f32.vlgmr.msra.gmra.mxu1 %vm48_vm1, %v128_v3  ;;  %689 = vmatprep.subr.mxu0 %v33_v5  ;;  %v211_v12 = vld [vmem:[%s899_s2] sm:$0xff]  ;;  %v304_v18 = vld [vmem:[%s901_s7 + $0x8] sm:$0xff]  ;;  %v738_v52 = vmov 839922192   ;;  %vm621_vm8 = vcmask 125952  }
   0x6   :  { %690 = vmatpush3.msra.mxu0 %v33_v5  ;;  %v666_v13 = vld [vmem:[%s900_s6] ss:$0 sm:$0xff]  ;;  %706 = vmatprep.subr.mxu1 %v304_v18  ;;  %v849_v41 = vsub.s32 %v405_v37, %v846_v38  ;;  %v435_v53 = vunpack.c.l.s4 %v738_v52  ;;  %v443_v56 = vsub.s32 0, %v846_v38  ;;  %v450_v60 = vsub.s32 1, %v846_v38 }
   0x7   :  { %691 = vmatprep.mubr.msk.f32.mxu0 %vm48_vm1, %v46_v8  ;;  %v303_v19 = vld [vmem:[%s901_s7] sm:$0xff]  ;;  %707 = vmatpush3.msra.mxu1 %v304_v18  ;;  %v457_v62 = vsub.s32 2, %v846_v38  ;;  %v464_v0 = vsub.s32 3, %v846_v38 }
   0x8   :  { %692 = vmatmul.mubr.msk.f32.vlgmr.msra.gmra.mxu0 %vm48_vm1, %v47_v11  ;;  %708 = vmatprep.subr.mxu1 %v303_v19  ;;  %v663_v22 = vld [vmem:[%s902_s4] ss:$0 sm:$0xff]  ;;  %v436_v54 = vunpack.c.0.s8 %v435_v53 }
   0x9   :  { %703 = vmatprep.mubr.msk.f32.mxu0 %vm213_vm2, %v211_v12  ;;  %709 = vmatpush3.msra.mxu1 %v303_v19 }
   0xa   :  { %717 = vset.pattern.permute.xlu0 %v737_v20  ;;  %v860_v55 = vsub.s32 %v436_v54, %v846_v38 }
  0xc5   :  { %v207_v14 = vpop.f32.mrf.mxu1 }
  0xc6   :  { %v208_v15 = vadd.f32 %v666_v13, %v207_v14 }
  0xc7   :  { %v700_v16 = vpop.f32.mrf.mxu1 }
  0xc8   :  { %701 = vmatprep.subr.msk.mxu0 %vm220_vm3, %v208_v15  ;;  %v693_v21 = vpop.f32.mrf.mxu0 }
  0xc9   :  { %702 = vmatpush3.msk.msra.mxu0 %vm220_vm3, %v208_v15  ;;  %v125_v24 = vadd.f32 %v693_v21, %v663_v22 }
  0xca   :  { %704 = vmatmul.mubr.msk.f32.vlgmr.msra.gmra.mxu0 %vm213_vm2, %v212_v17  ;;  %v119_v23 = vpop.f32.mrf.mxu0 }
  0xcb   :  { %v120_v26 = vadd.f32 %v663_v22, %v119_v23 }
 0x18a   :  { %v705_v25 = vpop.f32.mrf.mxu0 }
 0x18b   :  { %v300_v27 = vadd.f32 %v705_v25, %v125_v24 }
 0x18c   :  { %v290_v28 = vpop.f32.mrf.mxu0 }
 0x18d   :  { %v299_v29 = vadd.f32 %v290_v28, %v120_v26 }
 0x18f   :  { %721 = vtanh.f32 %v299_v29 }
 0x190   :  { %723 = vtanh.f32 %v300_v27 }
 0x19c   :  { %v722_v30 = vpop.eup %721 }
 0x19d   :  { %v724_v31 = vpop.eup %723  ;;  %710 = vmatprep.mubr.msk.f32.mxu1 %vm48_vm1, %v722_v30 }
 0x19e   :  { %711 = vmatmul.mubr.msk.f32.vlgmr.msra.gmra.mxu1 %vm48_vm1, %v724_v31 }
 0x25e   :  { %v712_v32 = vpop.f32.mrf.mxu1 }
 0x25f   :  { %399 = vperm.xlu1 %718, %v712_v32   ;;  %v389_v34 = vcombine.high %v712_v32, %v712_v32 }
 0x260   :  { %v377_v33 = vpop.f32.mrf.mxu1 }
 0x261   :  { %393 = vperm.xlu0 %717, %v377_v33   ;;  %v388_v35 = vcombine.high %v377_v33, %v377_v33 }
 0x263   :  { %402 = vperm.xlu1 %718, %v389_v34  }
 0x265   :  { %396 = vperm.xlu0 %717, %v388_v35  }
 0x2da   :  { %v400_v39 = vpop.permute.xlu1 %399 }
 0x2db   :  { %v417_v46 = vrot.slane %v400_v39, %v849_v41 }
 0x2dc   :  { %v394_v40 = vpop.permute.xlu0 %393 }
 0x2dd   :  { %v409_v44 = vrot.slane %v394_v40, %v849_v41 }
 0x2de   :  { %v403_v42 = vpop.permute.xlu1 %402 }
 0x2df   :  { %v421_v47 = vrot.slane %v403_v42, %v849_v41 }
 0x2e0   :  { %v397_v43 = vpop.permute.xlu0 %396 }
 0x2e1   :  { %v413_v45 = vrot.slane %v397_v43, %v849_v41 }
 0x2e3   :  { %v423_v48 = vsel %vm422_vm4, %v413_v45, %v409_v44 }
 0x2e4   :  { %v425_v49 = vsel %vm424_vm5, %v417_v46, %v423_v48 }
 0x2e5   :  { %v427_v50 = vsel %vm426_vm6, %v421_v47, %v425_v49 }
 0x2e6   :  { %v430_v51 = vsel %vm429_vm7, %v427_v50, -inf }
 0x2e7   :  { %431 = vmax.xlane.f32.xlu0 %v430_v51 }
 0x370   :  { %v432_v57 = vpop.xlane.xlu0 %431 }
 0x371   :  { %v440_v58 = vrot.slane %v432_v57, %v860_v55 }
 0x373   :  { %v444_v59 = vrot.slane %v440_v58, %v443_v56  ;;  %v451_v61 = vrot.slane %v440_v58, %v450_v60  ;;  %v458_v63 = vrot.slane %v440_v58, %v457_v62  ;;  %v465_v1 = vrot.slane %v440_v58, %v464_v0 }
 0x375   :  { %446 = vbcast.lane.b32.xlu1 %v444_v59, 256 }
 0x379   :  { %453 = vbcast.lane.b32.xlu1 %v451_v61, 256 }
 0x37d   :  { %460 = vbcast.lane.b32.xlu1 %v458_v63, 256 }
 0x381   :  { %467 = vbcast.lane.b32.xlu1 %v465_v1, 256 }
 0x3e7   :  { %v447_v2 = vpop.permute.xlu1 %446 }
 0x3e8   :  { %v473_v3 = vsub.f32 %v377_v33, %v447_v2 }
 0x3ea   :  { %v477_v4 = vmul.f32 1.442695, %v473_v3 }
 0x3eb   :  { %v454_v5 = vpop.permute.xlu1 %453 }
 0x3ec   :  { %725 = vpow2.f32 %v477_v4  ;;  %v474_v8 = vsub.f32 %v388_v35, %v454_v5 }
 0x3ee   :  { %v479_v11 = vmul.f32 1.442695, %v474_v8 }
 0x3ef   :  { %v461_v12 = vpop.permute.xlu1 %460 }
 0x3f0   :  { %727 = vpow2.f32 %v479_v11  ;;  %v475_v13 = vsub.f32 %v712_v32, %v461_v12 }
 0x3f2   :  { %v481_v14 = vmul.f32 1.442695, %v475_v13 }
 0x3f3   :  { %v468_v15 = vpop.permute.xlu1 %467 }
 0x3f4   :  { %729 = vpow2.f32 %v481_v14  ;;  %v476_v16 = vsub.f32 %v389_v34, %v468_v15 }
 0x3f6   :  { %v483_v17 = vmul.f32 1.442695, %v476_v16 }
 0x3f8   :  { %731 = vpow2.f32 %v483_v17 }
 0x3f9   :  { %v726_v18 = vpop.eup %725 }
 0x3fa   :  { %490 = vperm.xlu1 %718, %v726_v18  }
 0x3fd   :  { %v728_v19 = vpop.eup %727 }
 0x3fe   :  { %493 = vperm.xlu1 %718, %v728_v19  }
 0x401   :  { %v730_v20 = vpop.eup %729 }
 0x402   :  { %496 = vperm.xlu1 %718, %v730_v20  }
 0x405   :  { %v732_v21 = vpop.eup %731 }
 0x406   :  { %499 = vperm.xlu1 %718, %v732_v21  }
 0x475   :  { %v491_v22 = vpop.permute.xlu1 %490 }
 0x476   :  { %v504_v27 = vrot.slane %v491_v22, %v849_v41 }
 0x479   :  { %v494_v23 = vpop.permute.xlu1 %493 }
 0x47a   :  { %v508_v25 = vrot.slane %v494_v23, %v849_v41 }
 0x47c   :  { %v517_v29 = vsel %vm422_vm4, %v508_v25, %v504_v27 }
 0x47d   :  { %v497_v24 = vpop.permute.xlu1 %496 }
 0x47e   :  { %v512_v26 = vrot.slane %v497_v24, %v849_v41 }
 0x480   :  { %v518_v31 = vsel %vm424_vm5, %v512_v26, %v517_v29 }
 0x481   :  { %v500_v28 = vpop.permute.xlu1 %499 }
 0x482   :  { %v516_v30 = vrot.slane %v500_v28, %v849_v41 }
 0x484   :  { %v519_v32 = vsel %vm426_vm6, %v516_v30, %v518_v31 }
 0x485   :  { %v521_v33 = vsel %vm429_vm7, %v519_v32, 0.0 }
 0x486   :  { %522 = vadd.xlane.f32.xlu0 %v521_v33 }
 0x50f   :  { %v523_v34 = vpop.xlane.xlu0 %522 }
 0x510   :  { %733 = vrcp.f32 %v523_v34 }
 0x51d   :  { %v734_v35 = vpop.eup %733 }
 0x51e   :  { %v532_v36 = vrot.slane %v734_v35, %v860_v55 }
 0x520   :  { %v543_v37 = vrot.slane %v532_v36, %v450_v60  ;;  %v536_v38 = vrot.slane %v532_v36, %v443_v56  ;;  %v550_v39 = vrot.slane %v532_v36, %v457_v62  ;;  %v557_v40 = vrot.slane %v532_v36, %v464_v0 }
 0x522   :  { %545 = vbcast.lane.b32.xlu0 %v543_v37, 256  ;;  %538 = vbcast.lane.b32.xlu1 %v536_v38, 256 }
 0x526   :  { %552 = vbcast.lane.b32.xlu1 %v550_v39, 256 }
 0x52a   :  { %559 = vbcast.lane.b32.xlu1 %v557_v40, 256 }
 0x594   :  { %v539_v41 = vpop.permute.xlu1 %538  ;;  %v546_v43 = vpop.permute.xlu0 %545 }
 0x595   :  { %v565_v42 = vmul.f32 %v726_v18, %v539_v41  ;;  %v566_v45 = vmul.f32 %v728_v19, %v546_v43 }
 0x597   :  { %571 = vperm.xlu1 %718, %v565_v42  }
 0x598   :  { %v553_v44 = vpop.permute.xlu1 %552 }
 0x599   :  { %v567_v46 = vmul.f32 %v730_v20, %v553_v44 }
 0x59b   :  { %583 = vperm.xlu1 %718, %v566_v45  }
 0x59c   :  { %v560_v47 = vpop.permute.xlu1 %559 }
 0x59d   :  { %v568_v48 = vmul.f32 %v732_v21, %v560_v47 }
 0x59f   :  { %595 = vperm.xlu1 %718, %v567_v46  }
 0x5a3   :  { %607 = vperm.xlu1 %718, %v568_v48  }
 0x612   :  { %v572_v49 = vpop.permute.xlu1 %571 }
 0x613   :  { %v580_v50 = vrot.slane %v572_v49, %v860_v55 }
 0x615   :  { %v617_v51 = vmul.f32 %v580_v50, %v802_v6 }
 0x616   :  { %v584_v52 = vpop.permute.xlu1 %583 }
 0x617   :  { %v622_v53 = vsel %vm621_vm8, %v617_v51, 0.0  ;;  %v592_v54 = vrot.slane %v584_v52, %v860_v55 }
 0x618   :  { %v623_v56 = vrot.slane %v622_v53, 4 }
 0x619   :  { %v618_v57 = vmul.f32 %v592_v54, %v807_v7 }
 0x61a   :  { %v596_v58 = vpop.permute.xlu1 %595  ;;  %v624_v61 = vadd.f32 %v623_v56, %v622_v53 }
 0x61b   :  { %v629_v59 = vsel %vm621_vm8, %v618_v57, 0.0  ;;  %v604_v60 = vrot.slane %v596_v58, %v860_v55 }
 0x61c   :  { %v630_v62 = vrot.slane %v629_v59, 4  ;;  %v625_v3 = vrot.slane %v624_v61, 2 }
 0x61d   :  { %v619_v63 = vmul.f32 %v604_v60, %v816_v9 }
 0x61e   :  { %v631_v0 = vadd.f32 %v630_v62, %v629_v59  ;;  %v608_v1 = vpop.permute.xlu1 %607  ;;  %v626_v13 = vadd.f32 %v625_v3, %v624_v61 }
 0x61f   :  { %v636_v6 = vsel %vm621_vm8, %v619_v63, 0.0  ;;  %v616_v2 = vrot.slane %v608_v1, %v860_v55 }
 0x620   :  { %v632_v4 = vrot.slane %v631_v0, 2  ;;  %v637_v5 = vrot.slane %v636_v6, 4  ;;  %v627_v18 = vrot.slane %v626_v13, 1 }
 0x621   :  { %v620_v7 = vmul.f32 %v616_v2, %v821_v10 }
 0x622   :  { %v633_v8 = vadd.f32 %v632_v4, %v631_v0  ;;  %v638_v11 = vadd.f32 %v637_v5, %v636_v6  ;;  %v628_v23 = vadd.f32 %v627_v18, %v626_v13 }
 0x623   :  { %v643_v12 = vsel %vm621_vm8, %v620_v7, 0.0 }
 0x624   :  { %v639_v14 = vrot.slane %v638_v11, 2  ;;  %v644_v15 = vrot.slane %v643_v12, 4  ;;  %v634_v16 = vrot.slane %v633_v8, 1 }
 0x626   :  { %v640_v9 = vadd.f32 %v639_v14, %v638_v11  ;;  %v645_v17 = vadd.f32 %v644_v15, %v643_v12  ;;  %v635_v21 = vadd.f32 %v634_v16, %v633_v8 }
 0x628   :  { %v641_v19 = vrot.slane %v640_v9, 1  ;;  %v646_v20 = vrot.slane %v645_v17, 2  ;;  %v654_v10 = vsel %vm422_vm4, %v635_v21, %v628_v23 }
 0x62a   :  { %v647_v55 = vadd.f32 %v646_v20, %v645_v17  ;;  %v642_v22 = vadd.f32 %v641_v19, %v640_v9 }
 0x62c   :  { %v648_v24 = vrot.slane %v647_v55, 1  ;;  %v655_v26 = vsel %vm424_vm5, %v642_v22, %v654_v10 }
 0x62e   :  { %v649_v25 = vadd.f32 %v648_v24, %v647_v55 }
 0x630   :  { %v656_v27 = vsel %vm426_vm6, %v649_v25, %v655_v26 }
 0x631   :  { %658 = vst.msk [vmem:[%s903_s8] sm:$0xf] %vm621_vm8, %v656_v27 }

// kernel: _lambda_.12
= control target key start
LH: loop header
LB: loop body
LE: loop exit
PB: predicated region body
PF: predicated region fallthrough
CT: control target
= control target key end

     0   :  { %v1677_v0 = vmov 0.0   ;;  %vm1678_vm0 = vmmov 0   ;;  %vm211_vm1 = vcmask 130048   ;;  %v1679_v4 = vmov 1966171168   ;;  %s2102_s5 = inlined_call_operand.vmem [shape: f32[16,16], index: 5, kind: input, shape index: {}]   ;;  %s2103_s1 = inlined_call_operand.vmem [shape: f32[4,16], index: 1, kind: input, shape index: {}]   ;;  %s2104_s3 = inlined_call_operand.vmem [shape: f32[16,16], index: 3, kind: input, shape index: {}]   ;;  %s2105_s0 = inlined_call_operand.vmem [shape: f32[4,3,16], index: 0, kind: input, shape index: {}]   ;;  %s2106_s2 = inlined_call_operand.vmem [shape: f32[12,4], index: 2, kind: input, shape index: {}]   ;;  %s2107_s6 = inlined_call_operand.vmem [shape: f32[1,16], index: 6, kind: input, shape index: {}, may-alias: {4,6}]   ;;  %s2108_s7 = inlined_call_operand.vmem [shape: f32[16,1], index: 7, kind: input, shape index: {}]   ;;  %s2109_s4 = inlined_call_operand.vmem [shape: f32[1,16], index: 4, kind: input, shape index: {}, may-alias: {4,6}]   ;;  %s2110_s8 = inlined_call_operand.vmem [shape: f32[4,16], index: 8, kind: output, shape index: {}]  }
   0x1   :  { %1622 = vmatprep.subr.mxu1 %v1677_v0  ;;  %v293_v1 = vld [vmem:[%s2102_s5 + $0x8] sm:$0xff]  ;;  %v292_v2 = vld [vmem:[%s2102_s5] sm:$0xff]  ;;  %1626 = vmatprep.mubr.msk.f32.mxu1 %vm1678_vm0, %v1677_v0  ;;  %v46_v5 = vunpack.c.l.s4 %v1679_v4  ;;  %v48_v6 = vlaneseq  ;;  %vm376_vm2 = vcmask 31744   ;;  %vm383_vm3 = vcmask 1043456  }
   0x2   :  { %v291_v3 = vld [vmem:[%s2103_s1] sm:$0xf]  ;;  %1623 = vmatpush3.msra.mxu1 %v293_v1  ;;  %v130_v7 = vld [vmem:[%s2104_s3 + $0x8] sm:$0xff]  ;;  %vm758_vm4 = vcmask 1041409   ;;  %vm760_vm5 = vcmask 1042434   ;;  %vm762_vm6 = vcmask 1043459  }
   0x3   :  { %v129_v8 = vld [vmem:[%s2104_s3] sm:$0xff]  ;;  %1624 = vmatprep.subr.mxu1 %v1677_v0  ;;  %1615 = vmatprep.subr.mxu0 %v130_v7  ;;  %v47_v12 = vunpack.c.0.s8 %v46_v5  ;;  %v1748_v13 = vshrl.u32 %v48_v6, 7  ;;  %v1588_v14 = vld.sshfl [vmem:[%s2105_s0 + $0x8] sm:$0x13 pattern:$0x75316420] }
   0x4   :  { %v1586_v9 = vld.sshfl [vmem:[%s2105_s0] sm:$0x13 pattern:$0x75316420]  ;;  %1625 = vmatpush3.msra.mxu1 %v292_v2  ;;  %1616 = vmatpush3.msra.mxu0 %v130_v7  ;;  %v90_v17 = vcombine.high %v1588_v14, %v1588_v14  ;;  %v375_v56 = vld [vmem:[%s2106_s2 + $0x8] sm:$0xf] }
   0x5   :  { %v1587_v10 = vld.sshfl [vmem:[%s2105_s0 + $0x4] sm:$0x13 pattern:$0x75316420]  ;;  %v44_v11 = vcombine.high %v1586_v9, %v1586_v9  ;;  %1627 = vmatmul.mubr.msk.f32.vlgmr.msra.gmra.mxu1 %vm211_vm1, %v291_v3  ;;  %1617 = vmatprep.subr.mxu0 %v129_v8  ;;  %v1755_v16 = vsub.s32 %v47_v12, %v1748_v13  ;;  %v1593_v52 = vld [vmem:[%s2107_s6] ss:$0 sm:$0xff] }
   0x6   :  { %v67_v15 = vcombine.high %v1587_v10, %v1587_v10  ;;  %1618 = vmatpush3.msra.mxu0 %v129_v8  ;;  %v1589_v39 = vld.sshfl [vmem:[%s2105_s0 + $0xc] sm:$0x13 pattern:$0x75316420]  ;;  %v374_v51 = vld [vmem:[%s2106_s2] sm:$0xff]  ;;  %v1680_v7 = vmov 0  }
   0x7   :  { %v1758_v18 = vrot.slane %v1586_v9, %v1755_v16  ;;  %v1761_v19 = vrot.slane %v44_v11, %v1755_v16  ;;  %v1764_v20 = vrot.slane %v1587_v10, %v1755_v16  ;;  %v1770_v22 = vrot.slane %v1588_v14, %v1755_v16  ;;  %v467_v57 = vld [vmem:[%s2108_s7 + $0x8] sm:$0xff]  ;;  %v466_v58 = vld [vmem:[%s2108_s7] sm:$0xff]  ;;  %1645 = vset.pattern.permute.xlu0 %v1680_v7 }
   0x8   :  { %v1767_v21 = vrot.slane %v67_v15, %v1755_v16  ;;  %v1773_v23 = vrot.slane %v90_v17, %v1755_v16  ;;  %v113_v40 = vcombine.high %v1589_v39, %v1589_v39  ;;  %v1802_v41 = vrot.slane %v1589_v39, %v1755_v16  ;;  %1634 = vmatprep.subr.mxu1 %v467_v57  ;;  %v1590_v60 = vld [vmem:[%s2109_s4] ss:$0 sm:$0xff] }
   0x9   :  { %v1777_v24 = vcombine.high %v1758_v18, %v1758_v18  ;;  %v1781_v25 = vcombine.high %v1764_v20, %v1764_v20  ;;  %v138_v26 = vcombine.low %v1758_v18, %v1761_v19  ;;  %v1806_v42 = vcombine.high %v1770_v22, %v1770_v22  ;;  %1635 = vmatpush3.msra.mxu1 %v467_v57 }
   0xa   :  { %v141_v27 = vcombine.low %v1770_v22, %v1773_v23  ;;  %v1809_v43 = vrot.slane %v113_v40, %v1755_v16  ;;  %v1813_v44 = vcombine.high %v1802_v41, %v1802_v41  ;;  %1636 = vmatprep.subr.mxu1 %v466_v58  ;;  %1646 = vset.pattern.permute.xlu1 %v1680_v7  ;;  %vm765_vm7 = vcmask 19456  }
   0xb   :  { %v139_v28 = vcombine.low %v1777_v24, %v1764_v20  ;;  %v140_v29 = vcombine.low %v1767_v21, %v1781_v25  ;;  %v148_v30 = vrot.slane %v138_v26, %v1755_v16  ;;  %v187_v45 = vcombine.low %v1806_v42, %v1802_v41  ;;  %1637 = vmatpush3.msra.mxu1 %v466_v58 }
   0xc   :  { %v169_v31 = vrot.slane %v141_v27, %v1755_v16  ;;  %v188_v46 = vcombine.low %v1809_v43, %v1813_v44  ;;  %vm1543_vm8 = vcmask 124928   ;;  %vm1580_vm9 = vcmask 125952  }
   0xd   :  { %v155_v32 = vrot.slane %v139_v28, %v1755_v16  ;;  %v162_v33 = vrot.slane %v140_v29, %v1755_v16  ;;  %v195_v47 = vrot.slane %v187_v45, %v1755_v16 }
   0xe   :  { %v202_v48 = vrot.slane %v188_v46, %v1755_v16 }
   0xf   :  { %v170_v34 = vcombine.low %v148_v30, %v155_v32  ;;  %v171_v35 = vcombine.low %v162_v33, %v169_v31 }
  0x10   :  { %v203_v49 = vcombine.low %v195_v47, %v202_v48 }
  0x11   :  { %v178_v36 = vrot.slane %v170_v34, %v1755_v16  ;;  %v185_v37 = vrot.slane %v171_v35, %v1755_v16 }
  0x12   :  { %v210_v50 = vrot.slane %v203_v49, %v1755_v16 }
  0x13   :  { %v186_v38 = vcombine.low %v178_v36, %v185_v37 }
  0x15   :  { %1619 = vmatprep.mubr.msk.f32.mxu0 %vm211_vm1, %v186_v38 }
  0x16   :  { %1620 = vmatmul.mubr.msk.f32.vlgmr.msra.gmra.mxu0 %vm211_vm1, %v210_v50 }
  0x17   :  { %1631 = vmatprep.mubr.msk.f32.mxu0 %vm376_vm2, %v374_v51 }
  0xc5   :  { %v370_v53 = vpop.f32.mrf.mxu1 }
  0xc6   :  { %v371_v54 = vadd.f32 %v1593_v52, %v370_v53 }
  0xc7   :  { %v1628_v55 = vpop.f32.mrf.mxu1 }
  0xc8   :  { %1629 = vmatprep.subr.msk.mxu0 %vm383_vm3, %v371_v54 }
  0xc9   :  { %1630 = vmatpush3.msk.msra.mxu0 %vm383_vm3, %v371_v54 }
  0xca   :  { %1632 = vmatmul.mubr.msk.f32.vlgmr.msra.gmra.mxu0 %vm376_vm2, %v375_v56 }
  0xd6   :  { %v1621_v59 = vpop.f32.mrf.mxu0 }
  0xd7   :  { %v288_v62 = vadd.f32 %v1621_v59, %v1590_v60 }
  0xd8   :  { %v282_v61 = vpop.f32.mrf.mxu0 }
  0xd9   :  { %v283_v0 = vadd.f32 %v1590_v60, %v282_v61  ;;  %v741_v61 = vand.u32 127, %v48_v6 }
 0x18a   :  { %v1633_v63 = vpop.f32.mrf.mxu0 }
 0x18b   :  { %v463_v1 = vadd.f32 %v1633_v63, %v288_v62  ;;  %v1906_v63 = vsub.s32 %v741_v61, %v1748_v13 }
 0x18c   :  { %v453_v2 = vpop.f32.mrf.mxu0 }
 0x18d   :  { %v462_v3 = vadd.f32 %v453_v2, %v283_v0 }
 0x18f   :  { %1647 = vtanh.f32 %v462_v3 }
 0x190   :  { %1649 = vtanh.f32 %v463_v1 }
 0x19c   :  { %v1648_v4 = vpop.eup %1647 }
 0x19d   :  { %v1650_v5 = vpop.eup %1649  ;;  %1638 = vmatprep.mubr.msk.f32.mxu1 %vm211_vm1, %v1648_v4 }
 0x19e   :  { %1639 = vmatmul.mubr.msk.f32.vlgmr.msra.gmra.mxu1 %vm211_vm1, %v1650_v5 }
 0x25e   :  { %v1640_v8 = vpop.f32.mrf.mxu1 }
 0x25f   :  { %v606_v9 = vrot.slane %v1640_v8, %v1755_v16 }
 0x260   :  { %v540_v10 = vpop.f32.mrf.mxu1 }
 0x261   :  { %v607_v11 = vcombine.high %v606_v9, %v606_v9  ;;  %v1845_v12 = vrot.slane %v606_v9, %v1755_v16  ;;  %v551_v14 = vcombine.high %v540_v10, %v540_v10  ;;  %v558_v15 = vrot.slane %v540_v10, %v1755_v16 }
 0x263   :  { %v1849_v17 = vrot.slane %v607_v11, %v1755_v16  ;;  %v1853_v26 = vcombine.high %v1845_v12, %v1845_v12  ;;  %v565_v27 = vrot.slane %v551_v14, %v1755_v16  ;;  %v566_v28 = vcombine.high %v558_v15, %v558_v15 }
 0x264   :  { %v1857_v29 = vrot.slane %v558_v15, %v1755_v16  ;;  %v696_v48 = vrot.slane %v1845_v12, %v1755_v16  ;;  %v1917_v11 = vsub.s32 0, %v1748_v13  ;;  %v1920_v14 = vsub.s32 1, %v1748_v13 }
 0x265   :  { %v567_v30 = vcombine.high %v565_v27, %v565_v27  ;;  %v1860_v31 = vrot.slane %v566_v28, %v1755_v16  ;;  %v1868_v33 = vcombine.high %v1849_v17, %v1849_v17  ;;  %v705_v34 = vcombine.low %v1849_v17, %v1853_v26 }
 0x266   :  { %v1864_v32 = vcombine.high %v1857_v29, %v1857_v29  ;;  %v1873_v35 = vrot.slane %v565_v27, %v1755_v16  ;;  %v1923_v15 = vsub.s32 2, %v1748_v13  ;;  %v1926_v27 = vsub.s32 3, %v1748_v13 }
 0x267   :  { %v1876_v36 = vrot.slane %v567_v30, %v1755_v16  ;;  %v1880_v37 = vcombine.high %v1860_v31, %v1860_v31  ;;  %v636_v38 = vcombine.low %v1857_v29, %v1860_v31  ;;  %v712_v49 = vrot.slane %v705_v34, %v1755_v16 }
 0x268   :  { %v650_v45 = vrot.slane %v1864_v32, %v1755_v16  ;;  %v719_v50 = vrot.slane %v1868_v33, %v1755_v16 }
 0x269   :  { %v1600_v39 = vcombine.high %v1873_v35, %v1876_v36  ;;  %v643_v40 = vrot.slane %v636_v38, %v1755_v16  ;;  %v659_v46 = vcombine.low %v1880_v37, %v1873_v35  ;;  %v673_v53 = vrot.slane %v1876_v36, %v1755_v16 }
 0x26a   :  { %v720_v58 = vcombine.low %v712_v49, %v719_v50 }
 0x26b   :  { %v689_v47 = vrot.slane %v1600_v39, %v1755_v16  ;;  %v651_v51 = vcombine.low %v643_v40, %v650_v45  ;;  %v666_v52 = vrot.slane %v659_v46, %v1755_v16 }
 0x26c   :  { %v727_v60 = vrot.slane %v720_v58, %v1755_v16 }
 0x26d   :  { %v697_v54 = vcombine.low %v689_v47, %v696_v48  ;;  %v658_v55 = vrot.slane %v651_v51, %v1755_v16  ;;  %v674_v56 = vcombine.low %v666_v52, %v673_v53 }
 0x26f   :  { %v704_v57 = vrot.slane %v697_v54, %v1755_v16  ;;  %729 = vperm.xlu0 %1645, %v658_v55   ;;  %v681_v59 = vrot.slane %v674_v56, %v1755_v16 }
 0x271   :  { %735 = vperm.xlu1 %1646, %v704_v57  }
 0x273   :  { %732 = vperm.xlu0 %1645, %v681_v59  }
 0x275   :  { %738 = vperm.xlu1 %1646, %v727_v60  }
 0x2ea   :  { %v730_v62 = vpop.permute.xlu0 %729 }
 0x2eb   :  { %v745_v2 = vrot.slane %v730_v62, %v1906_v63 }
 0x2ec   :  { %v736_v0 = vpop.permute.xlu1 %735 }
 0x2ed   :  { %v753_v5 = vrot.slane %v736_v0, %v1906_v63 }
 0x2ee   :  { %v733_v1 = vpop.permute.xlu0 %732 }
 0x2ef   :  { %v749_v3 = vrot.slane %v733_v1, %v1906_v63 }
 0x2f0   :  { %v739_v4 = vpop.permute.xlu1 %738 }
 0x2f1   :  { %v757_v7 = vrot.slane %v739_v4, %v1906_v63  ;;  %v759_v6 = vsel %vm758_vm4, %v749_v3, %v745_v2 }
 0x2f2   :  { %v761_v8 = vsel %vm760_vm5, %v753_v5, %v759_v6 }
 0x2f3   :  { %v763_v9 = vsel %vm762_vm6, %v757_v7, %v761_v8 }
 0x2f4   :  { %v766_v10 = vsel %vm765_vm7, %v763_v9, -inf }
 0x2f5   :  { %767 = vmax.xlane.f32.xlu0 %v766_v10 }
 0x37e   :  { %v768_v28 = vpop.xlane.xlu0 %767 }
 0x37f   :  { %v773_v30 = vrot.slane %v768_v28, %v1917_v11  ;;  %v777_v34 = vrot.slane %v768_v28, %v1920_v14  ;;  %v781_v38 = vrot.slane %v768_v28, %v1923_v15  ;;  %v785_v39 = vrot.slane %v768_v28, %v1926_v27 }
 0x381   :  { %v786_v40 = vcombine.low %v773_v30, %v777_v34  ;;  %v787_v45 = vcombine.low %v781_v38, %v785_v39  ;;  %v597_v38 = vcombine.high %v1873_v35, %v1873_v35 }
 0x383   :  { %v794_v46 = vrot.slane %v786_v40, %v1755_v16  ;;  %v801_v47 = vrot.slane %v787_v45, %v1755_v16  ;;  %v599_v45 = vcombine.high %v1876_v36, %v1876_v36 }
 0x385   :  { %v802_v48 = vcombine.low %v794_v46, %v801_v47 }
 0x387   :  { %v809_v49 = vrot.slane %v802_v48, %v1755_v16 }
 0x389   :  { %v813_v13 = vrot.slane %v809_v49, %v1917_v11  ;;  %v820_v50 = vrot.slane %v809_v49, %v1920_v14  ;;  %v827_v51 = vrot.slane %v809_v49, %v1923_v15  ;;  %v834_v52 = vrot.slane %v809_v49, %v1926_v27 }
 0x38b   :  { %815 = vbcast.lane.b32.xlu1 %v813_v13, 256 }
 0x38f   :  { %822 = vbcast.lane.b32.xlu1 %v820_v50, 256 }
 0x393   :  { %829 = vbcast.lane.b32.xlu1 %v827_v51, 256 }
 0x397   :  { %836 = vbcast.lane.b32.xlu1 %v834_v52, 256 }
 0x3fd   :  { %v816_v53 = vpop.permute.xlu1 %815 }
 0x3fe   :  { %v844_v54 = vrot.slane %v816_v53, %v1755_v16 }
 0x400   :  { %v845_v55 = vcombine.high %v844_v54, %v844_v54  ;;  %v852_v56 = vrot.slane %v844_v54, %v1755_v16 }
 0x401   :  { %v823_v57 = vpop.permute.xlu1 %822 }
 0x402   :  { %v859_v58 = vrot.slane %v845_v55, %v1755_v16  ;;  %v860_v59 = vcombine.high %v852_v56, %v852_v56  ;;  %v942_v60 = vsub.f32 %v1857_v29, %v852_v56  ;;  %v867_v61 = vrot.slane %v823_v57, %v1755_v16 }
 0x404   :  { %v943_v62 = vsub.f32 %v1860_v31, %v859_v58  ;;  %v944_v0 = vsub.f32 %v1864_v32, %v860_v59  ;;  %v954_v1 = vmul.f32 1.442695, %v942_v60  ;;  %v868_v2 = vcombine.high %v867_v61, %v867_v61 }
 0x405   :  { %v875_v3 = vrot.slane %v867_v61, %v1755_v16  ;;  %v830_v4 = vpop.permute.xlu1 %829 }
 0x406   :  { %v956_v5 = vmul.f32 1.442695, %v943_v62  ;;  %v958_v7 = vmul.f32 1.442695, %v944_v0  ;;  %v882_v6 = vrot.slane %v868_v2, %v1755_v16  ;;  %1651 = vpow2.f32 %v954_v1 }
 0x407   :  { %v883_v8 = vcombine.high %v875_v3, %v875_v3  ;;  %v945_v9 = vsub.f32 %v1880_v37, %v875_v3  ;;  %v890_v29 = vrot.slane %v830_v4, %v1755_v16 }
 0x408   :  { %1653 = vpow2.f32 %v956_v5  ;;  %v946_v31 = vsub.f32 %v1873_v35, %v882_v6 }
 0x409   :  { %1655 = vpow2.f32 %v958_v7  ;;  %v947_v32 = vsub.f32 %v1876_v36, %v883_v8  ;;  %v960_v10 = vmul.f32 1.442695, %v945_v9  ;;  %v891_v28 = vcombine.high %v890_v29, %v890_v29  ;;  %v837_v30 = vpop.permute.xlu1 %836 }
 0x40a   :  { %v962_v34 = vmul.f32 1.442695, %v946_v31  ;;  %v898_v39 = vrot.slane %v890_v29, %v1755_v16  ;;  %v913_v40 = vrot.slane %v837_v30, %v1755_v16 }
 0x40b   :  { %1657 = vpow2.f32 %v960_v10  ;;  %v964_v37 = vmul.f32 1.442695, %v947_v32  ;;  %v905_v46 = vrot.slane %v891_v28, %v1755_v16 }
 0x40c   :  { %1659 = vpow2.f32 %v962_v34  ;;  %v906_v47 = vcombine.high %v898_v39, %v898_v39  ;;  %v948_v48 = vsub.f32 %v597_v38, %v898_v39  ;;  %v914_v49 = vcombine.high %v913_v40, %v913_v40 }
 0x40d   :  { %1661 = vpow2.f32 %v964_v37  ;;  %v949_v13 = vsub.f32 %v599_v45, %v905_v46  ;;  %v921_v50 = vrot.slane %v913_v40, %v1755_v16 }
 0x40e   :  { %v950_v35 = vsub.f32 %v1845_v12, %v906_v47  ;;  %v966_v51 = vmul.f32 1.442695, %v948_v48  ;;  %v928_v52 = vrot.slane %v914_v49, %v1755_v16 }
 0x40f   :  { %v968_v53 = vmul.f32 1.442695, %v949_v13  ;;  %v929_v54 = vcombine.high %v921_v50, %v921_v50  ;;  %v951_v55 = vsub.f32 %v1849_v17, %v921_v50 }
 0x410   :  { %1663 = vpow2.f32 %v966_v51  ;;  %v970_v36 = vmul.f32 1.442695, %v950_v35  ;;  %v952_v56 = vsub.f32 %v1853_v26, %v928_v52 }
 0x411   :  { %1665 = vpow2.f32 %v968_v53  ;;  %v953_v57 = vsub.f32 %v1868_v33, %v929_v54  ;;  %v972_v58 = vmul.f32 1.442695, %v951_v55 }
 0x412   :  { %1667 = vpow2.f32 %v970_v36  ;;  %v974_v59 = vmul.f32 1.442695, %v952_v56 }
 0x413   :  { %1669 = vpow2.f32 %v972_v58  ;;  %v976_v60 = vmul.f32 1.442695, %v953_v57  ;;  %v1965_v12 = vpop.eup %1651 }
 0x414   :  { %1671 = vpow2.f32 %v974_v59 }
 0x415   :  { %v1967_v61 = vpop.eup %1653  ;;  %1673 = vpow2.f32 %v976_v60 }
 0x416   :  { %v1969_v62 = vpop.eup %1655  ;;  %v990_v17 = vcombine.low %v1965_v12, %v1967_v61 }
 0x417   :  { %v1004_v0 = vrot.slane %v1969_v62, %v1755_v16 }
 0x418   :  { %v1973_v26 = vpop.eup %1657  ;;  %v997_v33 = vrot.slane %v990_v17, %v1755_v16 }
 0x419   :  { %v1978_v1 = vpop.eup %1659 }
 0x41a   :  { %v1980_v2 = vpop.eup %1661  ;;  %v1005_v3 = vcombine.low %v997_v33, %v1004_v0  ;;  %v1013_v4 = vcombine.low %v1973_v26, %v1978_v1 }
 0x41b   :  { %v1027_v6 = vrot.slane %v1980_v2, %v1755_v16 }
 0x41c   :  { %v1012_v5 = vrot.slane %v1005_v3, %v1755_v16  ;;  %v1020_v7 = vrot.slane %v1013_v4, %v1755_v16 }
 0x41d   :  { %v1988_v8 = vpop.eup %1663 }
 0x41e   :  { %v1990_v9 = vpop.eup %1665  ;;  %1083 = vperm.xlu1 %1646, %v1012_v5   ;;  %v1028_v29 = vcombine.low %v1020_v7, %v1027_v6 }
 0x41f   :  { %v1992_v31 = vpop.eup %1667  ;;  %v1036_v32 = vcombine.low %v1988_v8, %v1990_v9 }
 0x420   :  { %v1996_v10 = vpop.eup %1669  ;;  %v1035_v28 = vrot.slane %v1028_v29, %v1755_v16  ;;  %v1050_v38 = vrot.slane %v1992_v31, %v1755_v16 }
 0x421   :  { %v1999_v30 = vpop.eup %1671  ;;  %v1043_v34 = vrot.slane %v1036_v32, %v1755_v16 }
 0x422   :  { %v2004_v39 = vpop.eup %1673  ;;  %1086 = vperm.xlu1 %1646, %v1035_v28   ;;  %v1059_v40 = vcombine.low %v1996_v10, %v1999_v30 }
 0x423   :  { %v1051_v37 = vcombine.low %v1043_v34, %v1050_v38  ;;  %v1073_v46 = vrot.slane %v2004_v39, %v1755_v16 }
 0x424   :  { %v1066_v45 = vrot.slane %v1059_v40, %v1755_v16 }
 0x425   :  { %v1058_v47 = vrot.slane %v1051_v37, %v1755_v16 }
 0x426   :  { %v1074_v48 = vcombine.low %v1066_v45, %v1073_v46 }
 0x427   :  { %1089 = vperm.xlu1 %1646, %v1058_v47  }
 0x428   :  { %v1081_v49 = vrot.slane %v1074_v48, %v1755_v16 }
 0x42b   :  { %1092 = vperm.xlu1 %1646, %v1081_v49  }
 0x499   :  { %v1084_v13 = vpop.permute.xlu1 %1083 }
 0x49a   :  { %v1097_v53 = vrot.slane %v1084_v13, %v1906_v63 }
 0x49d   :  { %v1087_v50 = vpop.permute.xlu1 %1086 }
 0x49e   :  { %v1101_v51 = vrot.slane %v1087_v50, %v1906_v63 }
 0x4a0   :  { %v1110_v55 = vsel %vm758_vm4, %v1101_v51, %v1097_v53 }
 0x4a2   :  { %v1090_v35 = vpop.permute.xlu1 %1089 }
 0x4a3   :  { %v1105_v52 = vrot.slane %v1090_v35, %v1906_v63 }
 0x4a5   :  { %v1111_v56 = vsel %vm760_vm5, %v1105_v52, %v1110_v55 }
 0x4a6   :  { %v1093_v54 = vpop.permute.xlu1 %1092 }
 0x4a7   :  { %v1109_v36 = vrot.slane %v1093_v54, %v1906_v63 }
 0x4a9   :  { %v1112_v57 = vsel %vm762_vm6, %v1109_v36, %v1111_v56 }
 0x4aa   :  { %v1114_v58 = vsel %vm765_vm7, %v1112_v57, 0.0 }
 0x4ab   :  { %1115 = vadd.xlane.f32.xlu0 %v1114_v58 }
 0x534   :  { %v1116_v59 = vpop.xlane.xlu0 %1115 }
 0x535   :  { %1675 = vrcp.f32 %v1116_v59 }
 0x542   :  { %v1676_v60 = vpop.eup %1675 }
 0x543   :  { %v1122_v17 = vrot.slane %v1676_v60, %v1917_v11  ;;  %v1126_v33 = vrot.slane %v1676_v60, %v1920_v14  ;;  %v1130_v0 = vrot.slane %v1676_v60, %v1923_v15  ;;  %v1134_v3 = vrot.slane %v1676_v60, %v1926_v27 }
 0x545   :  { %v1135_v4 = vcombine.low %v1122_v17, %v1126_v33  ;;  %v1136_v63 = vcombine.low %v1130_v0, %v1134_v3 }
 0x547   :  { %v1143_v5 = vrot.slane %v1135_v4, %v1755_v16  ;;  %v1150_v7 = vrot.slane %v1136_v63, %v1755_v16 }
 0x549   :  { %v1151_v6 = vcombine.low %v1143_v5, %v1150_v7 }
 0x54b   :  { %v1158_v29 = vrot.slane %v1151_v6, %v1755_v16 }
 0x54d   :  { %v1169_v32 = vrot.slane %v1158_v29, %v1920_v14  ;;  %v1162_v28 = vrot.slane %v1158_v29, %v1917_v11  ;;  %v1176_v34 = vrot.slane %v1158_v29, %v1923_v15  ;;  %v1183_v38 = vrot.slane %v1158_v29, %v1926_v27 }
 0x54f   :  { %1171 = vbcast.lane.b32.xlu0 %v1169_v32, 256  ;;  %1164 = vbcast.lane.b32.xlu1 %v1162_v28, 256 }
 0x553   :  { %1178 = vbcast.lane.b32.xlu1 %v1176_v34, 256 }
 0x557   :  { %1185 = vbcast.lane.b32.xlu1 %v1183_v38, 256 }
 0x5c1   :  { %v1172_v40 = vpop.permute.xlu0 %1171  ;;  %v1165_v37 = vpop.permute.xlu1 %1164 }
 0x5c2   :  { %v1193_v45 = vrot.slane %v1165_v37, %v1755_v16  ;;  %v1216_v46 = vrot.slane %v1172_v40, %v1755_v16 }
 0x5c4   :  { %v1201_v47 = vrot.slane %v1193_v45, %v1755_v16  ;;  %v1224_v14 = vrot.slane %v1216_v46, %v1755_v16  ;;  %v1194_v49 = vcombine.high %v1193_v45, %v1193_v45  ;;  %v1217_v51 = vcombine.high %v1216_v46, %v1216_v46 }
 0x5c5   :  { %v1179_v48 = vpop.permute.xlu1 %1178 }
 0x5c6   :  { %v1239_v13 = vrot.slane %v1179_v48, %v1755_v16  ;;  %v1291_v15 = vmul.f32 %v1965_v12, %v1201_v47  ;;  %v1208_v52 = vrot.slane %v1194_v49, %v1755_v16  ;;  %v1294_v53 = vmul.f32 %v1973_v26, %v1224_v14 }
 0x5c7   :  { %v1231_v12 = vrot.slane %v1217_v51, %v1755_v16  ;;  %v1209_v56 = vcombine.high %v1201_v47, %v1201_v47  ;;  %v1232_v17 = vcombine.high %v1224_v14, %v1224_v14 }
 0x5c8   :  { %v1247_v50 = vrot.slane %v1239_v13, %v1755_v16  ;;  %1305 = vperm.xlu1 %1646, %v1291_v15   ;;  %v1240_v57 = vcombine.high %v1239_v13, %v1239_v13  ;;  %v1292_v58 = vmul.f32 %v1967_v61, %v1208_v52 }
 0x5c9   :  { %v1186_v27 = vpop.permute.xlu1 %1185  ;;  %v1295_v26 = vmul.f32 %v1978_v1, %v1231_v12  ;;  %v1296_v3 = vmul.f32 %v1980_v2, %v1232_v17 }
 0x5ca   :  { %v1262_v35 = vrot.slane %v1186_v27, %v1755_v16  ;;  %v1297_v54 = vmul.f32 %v1988_v8, %v1247_v50  ;;  %v1254_v59 = vrot.slane %v1240_v57, %v1755_v16  ;;  %v1255_v60 = vcombine.high %v1247_v50, %v1247_v50 }
 0x5cb   :  { %v1293_v8 = vmul.f32 %v1969_v62, %v1209_v56 }
 0x5cc   :  { %v1270_v55 = vrot.slane %v1262_v35, %v1755_v16  ;;  %1332 = vperm.xlu1 %1646, %v1294_v53   ;;  %1359 = vperm.xlu0 %1645, %v1297_v54   ;;  %v1263_v33 = vcombine.high %v1262_v35, %v1262_v35  ;;  %v1299_v0 = vmul.f32 %v1992_v31, %v1255_v60 }
 0x5ce   :  { %v1300_v36 = vmul.f32 %v1996_v10, %v1270_v55  ;;  %v1298_v10 = vmul.f32 %v1990_v9, %v1254_v59  ;;  %v1277_v61 = vrot.slane %v1263_v33, %v1755_v16  ;;  %v1278_v4 = vcombine.high %v1270_v55, %v1270_v55 }
 0x5d0   :  { %1314 = vperm.xlu1 %1646, %v1292_v58   ;;  %1386 = vperm.xlu0 %1645, %v1300_v36   ;;  %v1301_v1 = vmul.f32 %v1999_v30, %v1277_v61  ;;  %v1302_v62 = vmul.f32 %v2004_v39, %v1278_v4 }
 0x5d4   :  { %1341 = vperm.xlu1 %1646, %v1295_v26   ;;  %1323 = vperm.xlu0 %1645, %v1293_v8  }
 0x5d8   :  { %1368 = vperm.xlu1 %1646, %v1298_v10   ;;  %1377 = vperm.xlu0 %1645, %v1299_v0  }
 0x5dc   :  { %1350 = vperm.xlu1 %1646, %v1296_v3  }
 0x5e0   :  { %1395 = vperm.xlu1 %1646, %v1301_v1  }
 0x5e4   :  { %1404 = vperm.xlu1 %1646, %v1302_v62  }
 0x643   :  { %v1306_v63 = vpop.permute.xlu1 %1305 }
 0x644   :  { %v1311_v9 = vrot.slane %v1306_v63, %v1917_v11 }
 0x646   :  { %v1423_v32 = vmul.f32 %v1311_v9, %v1758_v18 }
 0x647   :  { %v1360_v5 = vpop.permute.xlu0 %1359  ;;  %v1333_v7 = vpop.permute.xlu1 %1332 }
 0x648   :  { %v1365_v40 = vrot.slane %v1360_v5, %v1917_v11  ;;  %v1338_v37 = vrot.slane %v1333_v7, %v1917_v11 }
 0x64a   :  { %v1429_v13 = vmul.f32 %v1365_v40, %v1770_v22  ;;  %v1426_v15 = vmul.f32 %v1338_v37, %v1764_v20 }
 0x64b   :  { %v1387_v31 = vpop.permute.xlu0 %1386  ;;  %v1315_v6 = vpop.permute.xlu1 %1314 }
 0x64c   :  { %v1320_v29 = vrot.slane %v1315_v6, %v1917_v11  ;;  %v1392_v54 = vrot.slane %v1387_v31, %v1917_v11 }
 0x64e   :  { %v1424_v2 = vmul.f32 %v1320_v29, %v1761_v19  ;;  %v1432_v59 = vmul.f32 %v1392_v54, %v1802_v41 }
 0x64f   :  { %v1324_v28 = vpop.permute.xlu0 %1323  ;;  %v1342_v34 = vpop.permute.xlu1 %1341 }
 0x650   :  { %v1447_v30 = vcombine.low %v1423_v32, %v1424_v2  ;;  %v1329_v38 = vrot.slane %v1324_v28, %v1917_v11  ;;  %v1347_v39 = vrot.slane %v1342_v34, %v1917_v11 }
 0x652   :  { %v1425_v45 = vmul.f32 %v1329_v38, %v1777_v24  ;;  %v1454_v46 = vrot.slane %v1447_v30, %v1755_v16  ;;  %v1427_v19 = vmul.f32 %v1347_v39, %v1767_v21 }
 0x653   :  { %v1378_v47 = vpop.permute.xlu0 %1377  ;;  %v1369_v48 = vpop.permute.xlu1 %1368 }
 0x654   :  { %v1461_v18 = vrot.slane %v1425_v45, %v1755_v16  ;;  %v1383_v14 = vrot.slane %v1378_v47, %v1917_v11  ;;  %v1374_v49 = vrot.slane %v1369_v48, %v1917_v11  ;;  %v1470_v52 = vcombine.low %v1426_v15, %v1427_v19 }
 0x656   :  { %v1462_v50 = vcombine.low %v1454_v46, %v1461_v18  ;;  %v1431_v27 = vmul.f32 %v1383_v14, %v1806_v42  ;;  %v1430_v24 = vmul.f32 %v1374_v49, %v1773_v23  ;;  %v1477_v23 = vrot.slane %v1470_v52, %v1755_v16 }
 0x657   :  { %v1351_v35 = vpop.permute.xlu1 %1350 }
 0x658   :  { %v1469_v51 = vrot.slane %v1462_v50, %v1755_v16  ;;  %v1493_v53 = vcombine.low %v1429_v13, %v1430_v24  ;;  %v1356_v21 = vrot.slane %v1351_v35, %v1917_v11  ;;  %v1507_v22 = vrot.slane %v1431_v27, %v1755_v16 }
 0x65a   :  { %v1544_v55 = vsel %vm1543_vm8, %v1469_v51, 0.0  ;;  %v1500_v20 = vrot.slane %v1493_v53, %v1755_v16  ;;  %v1428_v42 = vmul.f32 %v1356_v21, %v1781_v25 }
 0x65b   :  { %v1396_v36 = vpop.permute.xlu1 %1395  ;;  %v1545_v58 = vrot.slane %v1544_v55, 4 }
 0x65c   :  { %v1508_v12 = vcombine.low %v1500_v20, %v1507_v22  ;;  %v1484_v56 = vrot.slane %v1428_v42, %v1755_v16  ;;  %v1401_v57 = vrot.slane %v1396_v36, %v1917_v11 }
 0x65d   :  { %v1546_v61 = vadd.f32 %v1545_v58, %v1544_v55 }
 0x65e   :  { %v1515_v60 = vrot.slane %v1508_v12, %v1755_v16  ;;  %v1485_v26 = vcombine.low %v1477_v23, %v1484_v56  ;;  %v1433_v8 = vmul.f32 %v1401_v57, %v1809_v43 }
 0x65f   :  { %v1405_v17 = vpop.permute.xlu1 %1404  ;;  %v1547_v5 = vrot.slane %v1546_v61, 2 }
 0x660   :  { %v1558_v33 = vsel %vm1543_vm8, %v1515_v60, 0.0  ;;  %v1492_v25 = vrot.slane %v1485_v26, %v1755_v16  ;;  %v1516_v10 = vcombine.low %v1432_v59, %v1433_v8  ;;  %v1410_v0 = vrot.slane %v1405_v17, %v1917_v11 }
 0x661   :  { %v1559_v3 = vrot.slane %v1558_v33, 4  ;;  %v1548_v11 = vadd.f32 %v1547_v5, %v1546_v61 }
 0x662   :  { %v1551_v4 = vsel %vm1543_vm8, %v1492_v25, 0.0  ;;  %v1434_v1 = vmul.f32 %v1410_v0, %v1813_v44  ;;  %v1523_v63 = vrot.slane %v1516_v10, %v1755_v16 }
 0x663   :  { %v1552_v41 = vrot.slane %v1551_v4, 4  ;;  %v1560_v62 = vadd.f32 %v1559_v3, %v1558_v33  ;;  %v1549_v30 = vrot.slane %v1548_v11, 1 }
 0x664   :  { %v1530_v43 = vrot.slane %v1434_v1, %v1755_v16 }
 0x665   :  { %v1553_v7 = vadd.f32 %v1552_v41, %v1551_v4  ;;  %v1561_v6 = vrot.slane %v1560_v62, 2  ;;  %v1550_v45 = vadd.f32 %v1549_v30, %v1548_v11 }
 0x666   :  { %v1531_v9 = vcombine.low %v1523_v63, %v1530_v43 }
 0x667   :  { %v1554_v31 = vrot.slane %v1553_v7, 2  ;;  %v1562_v44 = vadd.f32 %v1561_v6, %v1560_v62 }
 0x668   :  { %v1538_v29 = vrot.slane %v1531_v9, %v1755_v16 }
 0x669   :  { %v1555_v32 = vadd.f32 %v1554_v31, %v1553_v7  ;;  %v1563_v37 = vrot.slane %v1562_v44, 1 }
 0x66a   :  { %v1565_v2 = vsel %vm1543_vm8, %v1538_v29, 0.0 }
 0x66b   :  { %v1556_v28 = vrot.slane %v1555_v32, 1  ;;  %v1566_v34 = vrot.slane %v1565_v2, 4  ;;  %v1564_v18 = vadd.f32 %v1563_v37, %v1562_v44 }
 0x66d   :  { %v1567_v38 = vadd.f32 %v1566_v34, %v1565_v2  ;;  %v1557_v39 = vadd.f32 %v1556_v28, %v1555_v32 }
 0x66f   :  { %v1568_v40 = vrot.slane %v1567_v38, 2  ;;  %v1576_v47 = vsel %vm758_vm4, %v1557_v39, %v1550_v45 }
 0x670   :  { %v1577_v19 = vsel %vm760_vm5, %v1564_v18, %v1576_v47 }
 0x671   :  { %v1569_v46 = vadd.f32 %v1568_v40, %v1567_v38 }
 0x673   :  { %v1570_v48 = vrot.slane %v1569_v46, 1 }
 0x675   :  { %v1571_v16 = vadd.f32 %v1570_v48, %v1569_v46 }
 0x677   :  { %v1578_v14 = vsel %vm762_vm6, %v1571_v16, %v1577_v19 }
 0x678   :  { %1581 = vst.msk [vmem:[%s2110_s8] sm:$0xf] %vm1580_vm9, %v1578_v14 }

</bundles_post_ra>
